<compile_context>
chip_gen: v7x
topology: tpu7x:2x2x1
jax: 0.10.0
libtpu: 0.0.40
codegen_flags: <defaults>
</compile_context>

<pallas_src>
import functools

import jax
import jax.numpy as jnp
from jax.experimental import pallas as pl
from jax.experimental.pallas import tpu as pltpu


def _conv_bn_silu_kernel(x_ref, w_ref, scale_ref, bias_ref, o_ref, col_ref, *,
                         TH, W, KH, KW, Cin):
    """Grid = (N, Ht//TH, Cout_p//TC).

    x_ref    : (1, Hp, Wp, Cin)       full padded NHWC frame (re-DMA'd only when n changes)
    w_ref    : (KH*KW*Cin, TC)        im2col-folded weights for this Cout tile
    scale_ref: (1, TC)                folded BN scale  = gamma / sqrt(var+eps)   (f32)
    bias_ref : (1, TC)                folded BN bias   = beta - mean*scale       (f32)
    o_ref    : (1, TH, W, TC)         NHWC output tile (TC is a multiple of 128 -> lane-dense)
    col_ref  : (TH*W, KH*KW*Cin)      VMEM im2col scratch, persistent across grid steps
    """
    hi = pl.program_id(1)
    co = pl.program_id(2)

    # Stage the im2col buffer once per (batch, row-tile).  The Cout axis is the
    # innermost ("arbitrary") grid axis, so this buffer is valid for every Cout
    # tile of the current row-tile.  Folding all KH*KW taps into the
    # contraction dim raises MXU K-utilization by KH*KW (9x for 3x3).
    @pl.when(co == 0)
    def _build_im2col():
        base = pl.multiple_of(hi * TH, TH)
        for kh in range(KH):                       # static unroll over taps
            for kw in range(KW):
                tap = kh * KW + kw
                xs = x_ref[0, pl.ds(base + kh, TH), pl.ds(kw, W), :]
                col_ref[:, tap * Cin:(tap + 1) * Cin] = xs.reshape(TH * W, Cin)

    # Single MXU matmul with native-dtype operands and f32 accumulation.
    acc = jnp.dot(col_ref[...], w_ref[...], preferred_element_type=jnp.float32)

    # Fused BatchNorm (inference, folded) + SiLU epilogue, 128-lane dense.
    y = acc * scale_ref[0, :][None, :] + bias_ref[0, :][None, :]
    y = y * jax.nn.sigmoid(y)                      # SiLU
    o_ref[0] = y.reshape(TH, W, -1).astype(o_ref.dtype)


def conv_bn_silu(x_nchw, weight_oihw, gamma, beta, running_mean, running_var,
                 *, stride=1, eps=1e-3, compute_dtype=None,
                 row_tile=8, cout_tile=128):
    """Forward of YOLOv5 Conv block.

    x_nchw: (N, Cin, H, W), weight: (Cout, Cin, KH, KW).  stride=1 (autopad 'same').
    compute_dtype: optional dtype (e.g. jnp.bfloat16) to feed the MXU; default
    keeps the native input dtype.
    """
    # TODO(synk): stride > 1 and even kernel sizes (YOLOv5 autopad) not implemented here.
    assert stride == 1, "this kernel implements stride=1 (autopad 'same')"
    N, Cin, H, W = x_nchw.shape
    Cout, Cin_w, KH, KW = weight_oihw.shape
    assert Cin == Cin_w
    assert KH % 2 == 1 and KW % 2 == 1, "autopad k//2 assumes odd kernel sizes"
    ph, pw = KH // 2, KW // 2

    # ---- tile sizes ----
    TH = min(row_tile, H)                       # spatial row tile
    TC = cout_tile                              # Cout tile (multiple of 128 -> lane-dense)
    Ht = ((H + TH - 1) // TH) * TH              # H padded up to a multiple of TH
    Cout_p = ((Cout + TC - 1) // TC) * TC       # Cout padded up to a multiple of TC
    K = KH * KW * Cin                           # folded contraction dim
    Hp, Wp = Ht + KH - 1, W + KW - 1

    # ---- glue (plain JAX): layout change, padding, BN folding ----
    x_nhwc = jnp.transpose(x_nchw, (0, 2, 3, 1))
    if compute_dtype is not None:
        x_nhwc = x_nhwc.astype(compute_dtype)
    x_pad = jnp.pad(
        x_nhwc,
        ((0, 0), (ph, (Ht - H) + (KH - 1 - ph)), (pw, KW - 1 - pw), (0, 0)))

    w2d = jnp.transpose(weight_oihw, (2, 3, 1, 0)).reshape(K, Cout)   # (K, Cout)
    if compute_dtype is not None:
        w2d = w2d.astype(compute_dtype)
    w2d = jnp.pad(w2d, ((0, 0), (0, Cout_p - Cout)))

    scale = (gamma / jnp.sqrt(running_var + eps)).astype(jnp.float32)   # (Cout,)
    bias = (beta.astype(jnp.float32) -
            running_mean.astype(jnp.float32) * scale)                   # (Cout,)
    scale_p = jnp.pad(scale, (0, Cout_p - Cout)).reshape(1, Cout_p)
    bias_p = jnp.pad(bias, (0, Cout_p - Cout)).reshape(1, Cout_p)

    kernel = functools.partial(_conv_bn_silu_kernel,
                               TH=TH, W=W, KH=KH, KW=KW, Cin=Cin)

    out_nhwc = pl.pallas_call(
        kernel,
        out_shape=jax.ShapeDtypeStruct((N, Ht, W, Cout_p), x_nchw.dtype),
        grid_spec=pltpu.PrefetchScalarGridSpec(
            num_scalar_prefetch=0,
            grid=(N, Ht // TH, Cout_p // TC),
            in_specs=[
                # Full padded frame; block index depends only on n, so it is
                # DMA'd once per batch element and reused across row/Cout tiles.
                pl.BlockSpec((1, Hp, Wp, Cin), lambda n, h, c: (n, 0, 0, 0)),
                # Weights tiled over the Cout axis (resident slab ∝ TC, not Cout).
                pl.BlockSpec((K, TC), lambda n, h, c: (0, c)),
                pl.BlockSpec((1, TC), lambda n, h, c: (0, c)),
                pl.BlockSpec((1, TC), lambda n, h, c: (0, c)),
            ],
            out_specs=pl.BlockSpec((1, TH, W, TC), lambda n, h, c: (n, h, 0, c)),
            scratch_shapes=[pltpu.VMEM((TH * W, K), x_pad.dtype)],
        ),
        compiler_params=pltpu.CompilerParams(
            # n and row-tile axes are independent -> megacore can shard them
            # (matters on v7x's 2 TCs even at batch 1).  The Cout axis reuses
            # the im2col scratch built at co == 0, so it must stay "arbitrary".
            dimension_semantics=("parallel", "parallel", "arbitrary"),
            # Tiles are sized so the working set stays well under the scoped
            # VMEM limit on v5e/v6e/v7x; 32 MiB raises v5e's 16 MiB default and
            # matches the v6e/v7x default.
            vmem_limit_bytes=32 * 1024 * 1024,
        ),
    )(x_pad, w2d, scale_p, bias_p)

    # Drop the H / Cout padding and go back to PyTorch NCHW convention.
    out = out_nhwc[:, :H, :, :Cout]
    return jnp.transpose(out, (0, 3, 1, 2))


def _reference(x_nchw, weight_oihw, gamma, beta, running_mean, running_var,
               *, eps=1e-3):
    y = jax.lax.conv_general_dilated(
        x_nchw.astype(jnp.float32), weight_oihw.astype(jnp.float32),
        window_strides=(1, 1), padding="SAME",
        dimension_numbers=("NCHW", "OIHW", "NCHW"))
    scale = gamma / jnp.sqrt(running_var + eps)
    bias = beta - running_mean * scale
    y = y * scale[None, :, None, None] + bias[None, :, None, None]
    return y * jax.nn.sigmoid(y)


if __name__ == "__main__":
    key = jax.random.PRNGKey(0)
    k_x, k_w, k_g, k_b, k_m, k_v = jax.random.split(key, 6)

    # Small shapes consistent with the module: Conv(c1=4, c2=8, k=3, s=1).
    N, Cin, H, W = 2, 4, 16, 16
    Cout, KH, KW = 8, 3, 3

    x = jax.random.normal(k_x, (N, Cin, H, W), dtype=jnp.float32)
    weight = jax.random.normal(k_w, (Cout, Cin, KH, KW), dtype=jnp.float32) * 0.1
    gamma = jax.random.uniform(k_g, (Cout,), dtype=jnp.float32, minval=0.5, maxval=1.5)
    beta = jax.random.normal(k_b, (Cout,), dtype=jnp.float32) * 0.1
    running_mean = jax.random.normal(k_m, (Cout,), dtype=jnp.float32) * 0.1
    running_var = jax.random.uniform(k_v, (Cout,), dtype=jnp.float32,
                                     minval=0.5, maxval=1.5)

    out = conv_bn_silu(x, weight, gamma, beta, running_mean, running_var)
    out = jax.block_until_ready(out)

    ref = _reference(x, weight, gamma, beta, running_mean, running_var)
    assert out.shape == (N, Cout, H, W)
    assert jnp.allclose(out, ref, atol=1e-4, rtol=1e-4)

    print("KERNEL_OK")
</pallas_src>

<mosaic_0001>
module attributes {stable_mosaic.version = 11 : i64} {
  func.func @_conv_bn_silu_kernel(%arg0: i32, %arg1: i32, %arg2: i32, %arg3: memref<1x18x18x4xf32, #tpu.memory_space<vmem>>, %arg4: memref<36x128xf32, #tpu.memory_space<vmem>>, %arg5: memref<1x128xf32, #tpu.memory_space<vmem>>, %arg6: memref<1x128xf32, #tpu.memory_space<vmem>>, %arg7: memref<1x8x16x128xf32, #tpu.memory_space<vmem>>, %arg8: memref<128x36xf32, #tpu.memory_space<vmem>>) attributes {dimension_semantics = [#tpu.dimension_semantics<parallel>, #tpu.dimension_semantics<parallel>, #tpu.dimension_semantics<arbitrary>], iteration_bounds = array<i64: 2, 2, 1>, scalar_prefetch = 0 : i64, scratch_operands = 1 : i64, tpu.core_type = #tpu.core_type<tc>, window_params = [{transform_indices = @transform_0, window_bounds = array<i64: 1, 18, 18, 4>}, {transform_indices = @transform_1, window_bounds = array<i64: 36, 128>}, {transform_indices = @transform_2, window_bounds = array<i64: 1, 128>}, {transform_indices = @transform_3, window_bounds = array<i64: 1, 128>}, {transform_indices = @transform_4, window_bounds = array<i64: 1, 8, 16, 128>}]} {
    %c0_i32 = arith.constant 0 : i32
    %0 = arith.cmpi eq, %arg2, %c0_i32 : i32
    %1 = arith.extui %0 : i1 to i32
    %c0_i32_0 = arith.constant 0 : i32
    %2 = arith.cmpi ne, %1, %c0_i32_0 : i32
    scf.if %2 {
      %c8_i32 = arith.constant 8 : i32
      %26 = arith.muli %arg1, %c8_i32 : i32
      %27 = tpu.assume_multiple %26, 8 : i32
      %c0_i32_13 = arith.constant 0 : i32
      %28 = arith.addi %27, %c0_i32_13 : i32
      %c0_14 = arith.constant 0 : index
      %29 = arith.index_cast %28 : i32 to index
      %c0_15 = arith.constant 0 : index
      %c0_16 = arith.constant 0 : index
      %30 = vector.load %arg3[%c0_14, %29, %c0_15, %c0_16] : memref<1x18x18x4xf32, #tpu.memory_space<vmem>>, vector<1x8x16x4xf32>
      %31 = vector.shape_cast %30 : vector<1x8x16x4xf32> to vector<8x16x4xf32>
      %32 = vector.shape_cast %31 : vector<8x16x4xf32> to vector<128x4xf32>
      %c0_17 = arith.constant 0 : index
      %c0_18 = arith.constant 0 : index
      %33 = vector.load %arg8[%c0_17, %c0_18] : memref<128x36xf32, #tpu.memory_space<vmem>>, vector<128x4xf32>
      tpu.vector_store %arg8[%c0_17, %c0_18], %32 {strides = array<i32>} : memref<128x36xf32, #tpu.memory_space<vmem>>, vector<128x4xf32>,
      %c0_i32_19 = arith.constant 0 : i32
      %34 = arith.addi %27, %c0_i32_19 : i32
      %c0_20 = arith.constant 0 : index
      %35 = arith.index_cast %34 : i32 to index
      %c1 = arith.constant 1 : index
      %c0_21 = arith.constant 0 : index
      %36 = vector.load %arg3[%c0_20, %35, %c1, %c0_21] : memref<1x18x18x4xf32, #tpu.memory_space<vmem>>, vector<1x8x16x4xf32>
      %37 = vector.shape_cast %36 : vector<1x8x16x4xf32> to vector<8x16x4xf32>
      %38 = vector.shape_cast %37 : vector<8x16x4xf32> to vector<128x4xf32>
      %c0_22 = arith.constant 0 : index
      %c4 = arith.constant 4 : index
      %39 = vector.load %arg8[%c0_22, %c4] : memref<128x36xf32, #tpu.memory_space<vmem>>, vector<128x4xf32>
      tpu.vector_store %arg8[%c0_22, %c4], %38 {strides = array<i32>} : memref<128x36xf32, #tpu.memory_space<vmem>>, vector<128x4xf32>,
      %c0_i32_23 = arith.constant 0 : i32
      %40 = arith.addi %27, %c0_i32_23 : i32
      %c0_24 = arith.constant 0 : index
      %41 = arith.index_cast %40 : i32 to index
      %c2 = arith.constant 2 : index
      %c0_25 = arith.constant 0 : index
      %42 = vector.load %arg3[%c0_24, %41, %c2, %c0_25] : memref<1x18x18x4xf32, #tpu.memory_space<vmem>>, vector<1x8x16x4xf32>
      %43 = vector.shape_cast %42 : vector<1x8x16x4xf32> to vector<8x16x4xf32>
      %44 = vector.shape_cast %43 : vector<8x16x4xf32> to vector<128x4xf32>
      %c0_26 = arith.constant 0 : index
      %c8 = arith.constant 8 : index
      %45 = vector.load %arg8[%c0_26, %c8] : memref<128x36xf32, #tpu.memory_space<vmem>>, vector<128x4xf32>
      tpu.vector_store %arg8[%c0_26, %c8], %44 {strides = array<i32>} : memref<128x36xf32, #tpu.memory_space<vmem>>, vector<128x4xf32>,
      %c1_i32 = arith.constant 1 : i32
      %46 = arith.addi %27, %c1_i32 : i32
      %c0_27 = arith.constant 0 : index
      %47 = arith.index_cast %46 : i32 to index
      %c0_28 = arith.constant 0 : index
      %c0_29 = arith.constant 0 : index
      %48 = vector.load %arg3[%c0_27, %47, %c0_28, %c0_29] : memref<1x18x18x4xf32, #tpu.memory_space<vmem>>, vector<1x8x16x4xf32>
      %49 = vector.shape_cast %48 : vector<1x8x16x4xf32> to vector<8x16x4xf32>
      %50 = vector.shape_cast %49 : vector<8x16x4xf32> to vector<128x4xf32>
      %c0_30 = arith.constant 0 : index
      %c12 = arith.constant 12 : index
      %51 = vector.load %arg8[%c0_30, %c12] : memref<128x36xf32, #tpu.memory_space<vmem>>, vector<128x4xf32>
      tpu.vector_store %arg8[%c0_30, %c12], %50 {strides = array<i32>} : memref<128x36xf32, #tpu.memory_space<vmem>>, vector<128x4xf32>,
      %c1_i32_31 = arith.constant 1 : i32
      %52 = arith.addi %27, %c1_i32_31 : i32
      %c0_32 = arith.constant 0 : index
      %53 = arith.index_cast %52 : i32 to index
      %c1_33 = arith.constant 1 : index
      %c0_34 = arith.constant 0 : index
      %54 = vector.load %arg3[%c0_32, %53, %c1_33, %c0_34] : memref<1x18x18x4xf32, #tpu.memory_space<vmem>>, vector<1x8x16x4xf32>
      %55 = vector.shape_cast %54 : vector<1x8x16x4xf32> to vector<8x16x4xf32>
      %56 = vector.shape_cast %55 : vector<8x16x4xf32> to vector<128x4xf32>
      %c0_35 = arith.constant 0 : index
      %c16 = arith.constant 16 : index
      %57 = vector.load %arg8[%c0_35, %c16] : memref<128x36xf32, #tpu.memory_space<vmem>>, vector<128x4xf32>
      tpu.vector_store %arg8[%c0_35, %c16], %56 {strides = array<i32>} : memref<128x36xf32, #tpu.memory_space<vmem>>, vector<128x4xf32>,
      %c1_i32_36 = arith.constant 1 : i32
      %58 = arith.addi %27, %c1_i32_36 : i32
      %c0_37 = arith.constant 0 : index
      %59 = arith.index_cast %58 : i32 to index
      %c2_38 = arith.constant 2 : index
      %c0_39 = arith.constant 0 : index
      %60 = vector.load %arg3[%c0_37, %59, %c2_38, %c0_39] : memref<1x18x18x4xf32, #tpu.memory_space<vmem>>, vector<1x8x16x4xf32>
      %61 = vector.shape_cast %60 : vector<1x8x16x4xf32> to vector<8x16x4xf32>
      %62 = vector.shape_cast %61 : vector<8x16x4xf32> to vector<128x4xf32>
      %c0_40 = arith.constant 0 : index
      %c20 = arith.constant 20 : index
      %63 = vector.load %arg8[%c0_40, %c20] : memref<128x36xf32, #tpu.memory_space<vmem>>, vector<128x4xf32>
      tpu.vector_store %arg8[%c0_40, %c20], %62 {strides = array<i32>} : memref<128x36xf32, #tpu.memory_space<vmem>>, vector<128x4xf32>,
      %c2_i32 = arith.constant 2 : i32
      %64 = arith.addi %27, %c2_i32 : i32
      %c0_41 = arith.constant 0 : index
      %65 = arith.index_cast %64 : i32 to index
      %c0_42 = arith.constant 0 : index
      %c0_43 = arith.constant 0 : index
      %66 = vector.load %arg3[%c0_41, %65, %c0_42, %c0_43] : memref<1x18x18x4xf32, #tpu.memory_space<vmem>>, vector<1x8x16x4xf32>
      %67 = vector.shape_cast %66 : vector<1x8x16x4xf32> to vector<8x16x4xf32>
      %68 = vector.shape_cast %67 : vector<8x16x4xf32> to vector<128x4xf32>
      %c0_44 = arith.constant 0 : index
      %c24 = arith.constant 24 : index
      %69 = vector.load %arg8[%c0_44, %c24] : memref<128x36xf32, #tpu.memory_space<vmem>>, vector<128x4xf32>
      tpu.vector_store %arg8[%c0_44, %c24], %68 {strides = array<i32>} : memref<128x36xf32, #tpu.memory_space<vmem>>, vector<128x4xf32>,
      %c2_i32_45 = arith.constant 2 : i32
      %70 = arith.addi %27, %c2_i32_45 : i32
      %c0_46 = arith.constant 0 : index
      %71 = arith.index_cast %70 : i32 to index
      %c1_47 = arith.constant 1 : index
      %c0_48 = arith.constant 0 : index
      %72 = vector.load %arg3[%c0_46, %71, %c1_47, %c0_48] : memref<1x18x18x4xf32, #tpu.memory_space<vmem>>, vector<1x8x16x4xf32>
      %73 = vector.shape_cast %72 : vector<1x8x16x4xf32> to vector<8x16x4xf32>
      %74 = vector.shape_cast %73 : vector<8x16x4xf32> to vector<128x4xf32>
      %c0_49 = arith.constant 0 : index
      %c28 = arith.constant 28 : index
      %75 = vector.load %arg8[%c0_49, %c28] : memref<128x36xf32, #tpu.memory_space<vmem>>, vector<128x4xf32>
      tpu.vector_store %arg8[%c0_49, %c28], %74 {strides = array<i32>} : memref<128x36xf32, #tpu.memory_space<vmem>>, vector<128x4xf32>,
      %c2_i32_50 = arith.constant 2 : i32
      %76 = arith.addi %27, %c2_i32_50 : i32
      %c0_51 = arith.constant 0 : index
      %77 = arith.index_cast %76 : i32 to index
      %c2_52 = arith.constant 2 : index
      %c0_53 = arith.constant 0 : index
      %78 = vector.load %arg3[%c0_51, %77, %c2_52, %c0_53] : memref<1x18x18x4xf32, #tpu.memory_space<vmem>>, vector<1x8x16x4xf32>
      %79 = vector.shape_cast %78 : vector<1x8x16x4xf32> to vector<8x16x4xf32>
      %80 = vector.shape_cast %79 : vector<8x16x4xf32> to vector<128x4xf32>
      %c0_54 = arith.constant 0 : index
      %c32 = arith.constant 32 : index
      %81 = vector.load %arg8[%c0_54, %c32] : memref<128x36xf32, #tpu.memory_space<vmem>>, vector<128x4xf32>
      tpu.vector_store %arg8[%c0_54, %c32], %80 {strides = array<i32>} : memref<128x36xf32, #tpu.memory_space<vmem>>, vector<128x4xf32>,
    } else {
    }
    %c0 = arith.constant 0 : index
    %c0_1 = arith.constant 0 : index
    %3 = vector.load %arg8[%c0, %c0_1] : memref<128x36xf32, #tpu.memory_space<vmem>>, vector<128x36xf32>
    %c0_2 = arith.constant 0 : index
    %c0_3 = arith.constant 0 : index
    %4 = vector.load %arg4[%c0_2, %c0_3] : memref<36x128xf32, #tpu.memory_space<vmem>>, vector<36x128xf32>
    %cst = arith.constant dense<0.000000e+00> : vector<128x128xf32>
    %5 = tpu.matmul %3, %4, %cst {dimension_numbers = #tpu.dot_dimension_numbers<[1], [0], [0], [1], [0, 0, 1, 1], [], []>} : vector<128x36xf32>, vector<36x128xf32>, vector<128x128xf32> -> vector<128x128xf32>
    %c0_4 = arith.constant 0 : index
    %c0_5 = arith.constant 0 : index
    %6 = vector.load %arg5[%c0_4, %c0_5] : memref<1x128xf32, #tpu.memory_space<vmem>>, vector<1x128xf32>
    %7 = vector.shape_cast %6 : vector<1x128xf32> to vector<128xf32>
    %8 = vector.shape_cast %7 : vector<128xf32> to vector<1x128xf32>
    %9 = vector.broadcast %8 : vector<1x128xf32> to vector<128x128xf32>
    %10 = arith.mulf %5, %9 : vector<128x128xf32>
    %c0_6 = arith.constant 0 : index
    %c0_7 = arith.constant 0 : index
    %11 = vector.load %arg6[%c0_6, %c0_7] : memref<1x128xf32, #tpu.memory_space<vmem>>, vector<1x128xf32>
    %12 = vector.shape_cast %11 : vector<1x128xf32> to vector<128xf32>
    %13 = vector.shape_cast %12 : vector<128xf32> to vector<1x128xf32>
    %14 = vector.broadcast %13 : vector<1x128xf32> to vector<128x128xf32>
    %15 = arith.addf %10, %14 : vector<128x128xf32>
    %16 = arith.negf %15 : vector<128x128xf32>
    %17 = math.exp %16 : vector<128x128xf32>
    %cst_8 = arith.constant 1.000000e+00 : f32
    %18 = vector.broadcast %cst_8 : f32 to vector<128x128xf32>
    %19 = arith.addf %18, %17 : vector<128x128xf32>
    %20 = arith.divf %18, %19 : vector<128x128xf32>
    %21 = arith.mulf %15, %20 : vector<128x128xf32>
    %22 = vector.shape_cast %21 : vector<128x128xf32> to vector<8x16x128xf32>
    %c0_9 = arith.constant 0 : index
    %c0_10 = arith.constant 0 : index
    %c0_11 = arith.constant 0 : index
    %c0_12 = arith.constant 0 : index
    %23 = vector.load %arg7[%c0_9, %c0_10, %c0_11, %c0_12] : memref<1x8x16x128xf32, #tpu.memory_space<vmem>>, vector<1x8x16x128xf32>
    %24 = vector.shape_cast %23 : vector<1x8x16x128xf32> to vector<8x16x128xf32>
    %25 = vector.shape_cast %22 : vector<8x16x128xf32> to vector<1x8x16x128xf32>
    tpu.vector_store %arg7[%c0_9, %c0_10, %c0_11, %c0_12], %25 {strides = array<i32>} : memref<1x8x16x128xf32, #tpu.memory_space<vmem>>, vector<1x8x16x128xf32>,
    return
  }
  func.func @transform_0(%arg0: i32, %arg1: i32, %arg2: i32) -> (i32, i32, i32, i32) {
    %c0_i32 = arith.constant 0 : i32
    %c0_i32_0 = arith.constant 0 : i32
    %c0_i32_1 = arith.constant 0 : i32
    %c0_i32_2 = arith.constant 0 : i32
    return %arg0, %c0_i32, %c0_i32_0, %c0_i32_1 : i32, i32, i32, i32
  }
  func.func @transform_1(%arg0: i32, %arg1: i32, %arg2: i32) -> (i32, i32) {
    %c0_i32 = arith.constant 0 : i32
    %c0_i32_0 = arith.constant 0 : i32
    return %c0_i32, %arg2 : i32, i32
  }
  func.func @transform_2(%arg0: i32, %arg1: i32, %arg2: i32) -> (i32, i32) {
    %c0_i32 = arith.constant 0 : i32
    %c0_i32_0 = arith.constant 0 : i32
    return %c0_i32, %arg2 : i32, i32
  }
  func.func @transform_3(%arg0: i32, %arg1: i32, %arg2: i32) -> (i32, i32) {
    %c0_i32 = arith.constant 0 : i32
    %c0_i32_0 = arith.constant 0 : i32
    return %c0_i32, %arg2 : i32, i32
  }
  func.func @transform_4(%arg0: i32, %arg1: i32, %arg2: i32) -> (i32, i32, i32, i32) {
    %c0_i32 = arith.constant 0 : i32
    %c0_i32_0 = arith.constant 0 : i32
    return %arg0, %arg1, %c0_i32, %arg2 : i32, i32, i32, i32
  }
}

</mosaic_0001>

<bundles_post_ra>
// kernel: tpu_custom_call.1
= control target key start
LH: loop header
LB: loop body
LE: loop exit
PB: predicated region body
PF: predicated region fallthrough
CT: control target
= control target key end

     0   :  { %9 = vsyncpa [#allocation4], 0  ;;  %s2797_s0 = inlined_call_operand.vmem [shape: f32[2,18,18,4], index: 0, kind: input, shape index: {}]   ;;  %s2798_s1 = inlined_call_operand.vmem [shape: f32[36,128], index: 1, kind: input, shape index: {}]   ;;  %s2799_s2 = inlined_call_operand.vmem [shape: f32[1,128], index: 2, kind: input, shape index: {}]   ;;  %s2800_s3 = inlined_call_operand.vmem [shape: f32[1,128], index: 3, kind: input, shape index: {}]   ;;  %s2801_s4 = inlined_call_operand.hbm [shape: f32[2,16,16,128], index: 4, kind: output, shape index: {}]  }
   0x1   :  { %11 = vsyncpa [#allocation4 + $0x1], 0  ;;  %s2127_s15 = smov 0   ;;  %s2129_s16 = smov 0  }
   0x2   :  { %s2131_s17 = smov 0   ;;  %s2133_s18 = smov 0  }
   0x3   :  { %s2135_s19 = smov 0   ;;  %s2137_s20 = smov 0  }
   0x4   :  { %s2139_s21 = smov 0   ;;  %s2141_s22 = smov 0  }
   0x5 LB: > { %s1627_s23 = sadd.s32 4294967295, %s2090_s22   ;;  %s1628_s24 = sadd.s32 4294967294, %s2090_s22   ;;  %s2090_s22 = sphi %s2141_s22, %s17_s22   ;;  %s2086_s21 = sphi %s2139_s21, %s2816_s21   ;;  %s2082_s20 = sphi %s2137_s20, %s2815_s20   ;;  %s2078_s19 = sphi %s2135_s19, %s2814_s19   ;;  %s2074_s18 = sphi %s2133_s18, %s2813_s18   ;;  %s2070_s17 = sphi %s2131_s17, %s2812_s17   ;;  %s2066_s16 = sphi %s2129_s16, %s2811_s16   ;;  %s2062_s15 = sphi %s2127_s15, %s2810_s15  }
   0x6   : > { %s32_s25 = sadd.s32 1, %s2082_s20  ;;  %s36_s26 = sadd.s32 1, %s2086_s21 }
   0x7   : > { %p34_p0 = scmp.ge.s32.totalorder %s32_s25, 2  ;;  %p161_p1 = scmp.ne.s32.totalorder %s2070_s17, %s2066_s16 }
   0x8   : > { %p162_p2 = scmp.eq.s32.totalorder %s1627_s23, 3  ;;  %p167_p5 = scmp.ne.s32.totalorder %s2066_s16, %s2062_s15 }
   0x9   : > { %s2818_s25 = smov (%p34_p0, %s32_s25), 0  ;;  %s2820_s26 = smov (!%p34_p0, %s36_s26), %s2086_s21 }
   0xa   : > { %s145_s27 = ssub.s32 %s2082_s20, %s2818_s25  ;;  %p2178_p3 = por %p162_p2, %p161_p1 }
   0xb   : > { %p38_p4 = scmp.ge.s32.totalorder %s2820_s26, 2  ;;  %p168_p6 = scmp.eq.s32.totalorder %s1628_s24, 3 }
   0xc   : > { %p1634_p7 = scmp.ge.s32.totalorder %s2090_s22, 1  ;;  %p213_p9 = scmp.lt.s32.totalorder %s2090_s22, 5 }
   0xd   : > { %s2822_s26 = smov (%p38_p4, %s2820_s26), 0  ;;  %p2187_p8 = por %p168_p6, %p167_p5 }
   0xe   : > { %s144_s30 = ssub.s32 %s2086_s21, %s2822_s26  ;;  %s151_s5 = sadd.s32 1, %s2070_s17 }
   0xf   : > { %s146_s6 = sor.u32 %s145_s27, %s144_s30  ;;  %p214_p10 = pnand %p1634_p7, %p213_p9 }
  0x10   : > { %p149_p11 = scmp.eq.s32.totalorder %s146_s6, 0  ;;  %p249_p12 = scmp.lt.s32.totalorder (!%p214_p10), %s2078_s19, 1  ;;  %vm288_vm0 = vcmask (!%p214_p10), 31744   ;;  %v1103_v38 = vld [vmem:[%s2798_s1] sm:$0xff] (!%p214_p10)  ;;  %v1104_v39 = vld [vmem:[%s2798_s1 + $0x8] sm:$0xff] (!%p214_p10)  ;;  %v1105_v41 = vld [vmem:[%s2798_s1 + $0x10] sm:$0xff] (!%p214_p10) }
  0x11   : > { %217 = sbr.rel (%p214_p10) target bundleno = 669 (0x29d), region = 36  ;;  %s2092_s23 = smov (!%p214_p10), 4   ;;  %v1837_v40 = vpack.c.bf16 (!%p214_p10), %v1104_v39, %v1103_v38  ;;  %v1106_v42 = vld [vmem:[%s2798_s1 + $0x18] sm:$0xff] (!%p214_p10)  ;;  %v1107_v44 = vld [vmem:[%s2798_s1 + $0x20] sm:$0xf] (!%p214_p10)  ;;  %vm1157_vm1 = vcmask (!%p214_p10), 1043456  }
  0x12   : > { %s2196_s7 = scalar_select %p149_p11, %s2070_s17, %s151_s5  }
  0x13   : > { %s1638_s9 = smul.u32 (!%p214_p10), 192, %s2074_s18  ;;  %s2093_s24 = smov (!%p214_p10), 8   ;;  %1838 = vmatprep.subr.bf16.mxu0 (!%p214_p10), %v1837_v40  ;;  %1845 = vmatprep.subr.bf16.mxu1 (!%p214_p10), %v1837_v40  ;;  %v1841_v43 = vpack.c.bf16 (!%p214_p10), %v1106_v42, %v1105_v41  ;;  %vm385_vm2 = vcmask (!%p214_p10), 64544   ;;  %vm482_vm3 = vcmask (!%p214_p10), 97344   ;;  %vm582_vm4 = vcmask (!%p214_p10), 130144  }
  0x14   : > { %s2804_s27 = smov (!%p214_p10), 12   ;;  %s2095_s30 = smov (!%p214_p10), 16   ;;  %1840 = vmatpush3.bf16.msra.mxu0 (!%p214_p10), %v1837_v40  ;;  %1848 = vmatpush3.bf16.msra.mxu1 (!%p214_p10), %v1837_v40  ;;  %vm679_vm5 = vcmask (!%p214_p10), 162944   ;;  %vm776_vm6 = vcmask (!%p214_p10), 195744   ;;  %vm876_vm7 = vcmask (!%p214_p10), 228544   ;;  %vm973_vm8 = vcmask (!%p214_p10), 261344  }
  0x15   : > { %s2096_s5 = smov (!%p214_p10), 20   ;;  %s2097_s6 = smov (!%p214_p10), 24   ;;  %1842 = vmatprep.subr.bf16.mxu0 (!%p214_p10), %v1841_v43  ;;  %1846 = vmatprep.subr.bf16.mxu1 (!%p214_p10), %v1841_v43  ;;  %vm1070_vm9 = vcmask (!%p214_p10), 294144   ;;  %vm1108_vm10 = vcmask (!%p214_p10), 293888  }
  0x16   : > { %s2808_s11 = smov (!%p214_p10), 12   ;;  %s2809_s12 = smov (!%p214_p10), 28  }
  0x18   : > { %s250_s8 = scalar_select %p249_p12, %s2078_s19, 1  ;;  %1844 = vmatpush3.bf16.msra.mxu0 %v1841_v43  ;;  %1849 = vmatpush3.bf16.msra.mxu1 %v1841_v43 }
  0x19   : > { %1811 = vmatprep.subr.msk.mxu0 %vm1157_vm1, %v1107_v44  ;;  %1847 = vmatprep.subr.msk.mxu1 %vm1157_vm1, %v1107_v44 }
  0x1a   : > { %s1851_s10 = smul.u32 432, %s250_s8  ;;  %s2802_s8 = smov 28  }
  0x1c   : > { %s253_s13 = scalar_lea.vmem %s2797_s0, %s1851_s10  ;;  %1812 = vmatpush3.msk.msra.mxu0 %vm1157_vm1, %v1107_v44  ;;  %1850 = vmatpush3.msk.msra.mxu1 %vm1157_vm1, %v1107_v44  ;;  %s1781_s10 = sshll.u32 %s2074_s18, 4 }
  0x1d   : > { %s2204_s14 = scalar_lea.vmem %s253_s13, %s1638_s9  ;;  %s2099_s13 = smov 32  }
  0x1e   : > { %v306_v0 = vld [vmem:[%s2204_s14 + $0x9] sm:$0xff]  ;;  %v305_v1 = vld [vmem:[%s2204_s14 + $0x1] sm:$0xff]  ;;  %v2217_v4 = vld [vmem:[%s2204_s14 + $0x78] sm:$0xff] }
  0x1f   : > { %339 = vrot.lane.b32.xlu1 %v306_v0, %s2092_s23  ;;  %337 = vrot.lane.b32.xlu0 %v305_v1, %s2092_s23  ;;  %v2211_v2 = vld [vmem:[%s2204_s14 + $0x69] sm:$0xff]  ;;  %v2214_v3 = vld [vmem:[%s2204_s14 + $0x61] sm:$0xff]  ;;  %299 = vst.msk [vmem:[#allocation2 + $0x50] sm:$0xff] %vm288_vm0, %v2217_v4 }
  0x20   : > { %v1641_v5 = vld [vmem:[%s2204_s14 + $0x18] sm:$0xff]  ;;  %v2221_v6 = vld [vmem:[%s2204_s14 + $0x80] sm:$0xff]  ;;  %v2239_v10 = vld [vmem:[%s2204_s14 + $0x90] sm:$0xff] }
  0x21   : > { %v1642_v7 = vld [vmem:[%s2204_s14 + $0x20] sm:$0xff]  ;;  %291 = vst.msk [vmem:[#allocation2 + $0x10] sm:$0xff] %vm288_vm0, %v1641_v5  ;;  %300 = vst.msk [vmem:[#allocation2 + $0x58] sm:$0xff] %vm288_vm0, %v2221_v6  ;;  %v2242_v11 = vld [vmem:[%s2204_s14 + $0x30] sm:$0xff] }
  0x22   : > { %292 = vst.msk [vmem:[#allocation2 + $0x18] sm:$0xff] %vm288_vm0, %v1642_v7  ;;  %v2235_v8 = vld [vmem:[%s2204_s14 + $0x62] sm:$0xff]  ;;  %v2245_v12 = vld [vmem:[%s2204_s14 + $0x98] sm:$0xff]  ;;  %301 = vst.msk [vmem:[#allocation2 + $0x60] sm:$0xff] %vm288_vm0, %v2239_v10 }
  0x23   : > { %355 = vrot.lane.b32.xlu1 %v2211_v2, %s2092_s23  ;;  %353 = vrot.lane.b32.xlu0 %v2214_v3, %s2092_s23  ;;  %v402_v9 = vld [vmem:[%s2204_s14 + $0x2] sm:$0xff]  ;;  %v2248_v13 = vld [vmem:[%s2204_s14 + $0x38] sm:$0xff]  ;;  %293 = vst.msk [vmem:[#allocation2 + $0x20] sm:$0xff] %vm288_vm0, %v2242_v11  ;;  %302 = vst.msk [vmem:[#allocation2 + $0x68] sm:$0xff] %vm288_vm0, %v2245_v12 }
  0x24   : > { %294 = vst.msk [vmem:[#allocation2 + $0x28] sm:$0xff] %vm288_vm0, %v2248_v13  ;;  %v2262_v14 = vld [vmem:[%s2204_s14 + $0x6a] sm:$0xff]  ;;  %v272_v17 = vld [vmem:[%s2204_s14] sm:$0xff]  ;;  %v1731_v36 = vld [vmem:[%s2204_s14 + $0x92] sm:$0xff] }
  0x25   : > { %v403_v15 = vld [vmem:[%s2204_s14 + $0xa] sm:$0xff]  ;;  %289 = vst.msk [vmem:[#allocation2] sm:$0xff] %vm288_vm0, %v272_v17  ;;  %v2282_v21 = vld [vmem:[%s2204_s14 + $0x60] sm:$0xff]  ;;  %v1723_v37 = vld [vmem:[%s2204_s14 + $0x32] sm:$0xff] }
  0x26   : > { %v273_v16 = vld [vmem:[%s2204_s14 + $0x8] sm:$0xff]  ;;  %297 = vst.msk [vmem:[#allocation2 + $0x40] sm:$0xff] %vm288_vm0, %v2282_v21  ;;  %v2293_v22 = vld [vmem:[%s2204_s14 + $0xb0] sm:$0xff]  ;;  %v2309_v24 = vld [vmem:[%s2204_s14 + $0x79] sm:$0xff] }
  0x27   : > { %450 = vrot.lane.b32.xlu1 %v2235_v8, %s2093_s24  ;;  %434 = vrot.lane.b32.xlu0 %v402_v9, %s2093_s24  ;;  %290 = vst.msk [vmem:[#allocation2 + $0x8] sm:$0xff] %vm288_vm0, %v273_v16  ;;  %v2269_v18 = vld [vmem:[%s2204_s14 + $0xa8] sm:$0xff]  ;;  %v2296_v23 = vld [vmem:[%s2204_s14 + $0x50] sm:$0xff]  ;;  %304 = vst.msk [vmem:[#allocation2 + $0x78] sm:$0xff] %vm288_vm0, %v2293_v22 }
  0x28   : > { %v2272_v19 = vld [vmem:[%s2204_s14 + $0x48] sm:$0xff]  ;;  %303 = vst.msk [vmem:[#allocation2 + $0x70] sm:$0xff] %vm288_vm0, %v2269_v18  ;;  %296 = vst.msk [vmem:[#allocation2 + $0x38] sm:$0xff] %vm288_vm0, %v2296_v23  ;;  %v1657_v25 = vld [vmem:[%s2204_s14 + $0x19] sm:$0xff] }
  0x29   : > { %v2279_v20 = vld [vmem:[%s2204_s14 + $0x68] sm:$0xff]  ;;  %295 = vst.msk [vmem:[#allocation2 + $0x30] sm:$0xff] %vm288_vm0, %v2272_v19  ;;  %v2326_v28 = vld [vmem:[%s2204_s14 + $0x7a] sm:$0xff]  ;;  %v1715_v32 = vld [vmem:[%s2204_s14 + $0x91] sm:$0xff] }
  0x2a   : > { %298 = vst.msk [vmem:[#allocation2 + $0x48] sm:$0xff] %vm288_vm0, %v2279_v20  ;;  %v2319_v26 = vld [vmem:[%s2204_s14 + $0x81] sm:$0xff]  ;;  %v1707_v33 = vld [vmem:[%s2204_s14 + $0x31] sm:$0xff]  ;;  %v1716_v34 = vld [vmem:[%s2204_s14 + $0x99] sm:$0xff] }
  0x2b   : > { %452 = vrot.lane.b32.xlu1 %v2262_v14, %s2093_s24  ;;  %436 = vrot.lane.b32.xlu0 %v403_v15, %s2093_s24  ;;  %v1658_v27 = vld [vmem:[%s2204_s14 + $0x21] sm:$0xff]  ;;  %v1708_v35 = vld [vmem:[%s2204_s14 + $0x39] sm:$0xff] }
  0x2c   : > { %v1673_v29 = vld [vmem:[%s2204_s14 + $0x1a] sm:$0xff]  ;;  %v2339_v30 = vld [vmem:[%s2204_s14 + $0x82] sm:$0xff]  ;;  %v1718_v63 = vld [vmem:[%s2204_s14 + $0xb1] sm:$0xff] }
  0x2d   : > { %v1674_v31 = vld [vmem:[%s2204_s14 + $0x22] sm:$0xff]  ;;  %v1732_v45 = vld [vmem:[%s2204_s14 + $0x9a] sm:$0xff]  ;;  %v1710_v0 = vld [vmem:[%s2204_s14 + $0x51] sm:$0xff] }
  0x2e   : > { %v1724_v46 = vld [vmem:[%s2204_s14 + $0x3a] sm:$0xff]  ;;  %v1717_v55 = vld [vmem:[%s2204_s14 + $0xa9] sm:$0xff] }
  0x2f   : > { %550 = vrot.lane.b32.xlu1 %v2217_v4, %s2804_s27  ;;  %534 = vrot.lane.b32.xlu0 %v1641_v5, %s2804_s27  ;;  %v1709_v56 = vld [vmem:[%s2204_s14 + $0x49] sm:$0xff] }
  0x30   : > { %v1725_v9 = vld [vmem:[%s2204_s14 + $0x4a] sm:$0xff] }
  0x31   : > { %v1704_v42 = vld [vmem:[%s2204_s14 + $0xc8] sm:$0xff] }
  0x33   : > { %552 = vrot.lane.b32.xlu1 %v2221_v6, %s2804_s27  ;;  %536 = vrot.lane.b32.xlu0 %v1642_v7, %s2804_s27  ;;  %v1733_v7 = vld [vmem:[%s2204_s14 + $0xaa] sm:$0xff] }
  0x37   : > { %647 = vrot.lane.b32.xlu1 %v2309_v24, %s2095_s30  ;;  %631 = vrot.lane.b32.xlu0 %v1657_v25, %s2095_s30 }
  0x3b   : > { %357 = vrot.lane.b32.xlu1 %v2309_v24, %s2092_s23  ;;  %341 = vrot.lane.b32.xlu0 %v1657_v25, %s2092_s23 }
  0x3f   : > { %649 = vrot.lane.b32.xlu1 %v2319_v26, %s2095_s30  ;;  %633 = vrot.lane.b32.xlu0 %v1658_v27, %s2095_s30 }
  0x43   : > { %744 = vrot.lane.b32.xlu1 %v2326_v28, %s2096_s5  ;;  %728 = vrot.lane.b32.xlu0 %v1673_v29, %s2096_s5 }
  0x47   : > { %359 = vrot.lane.b32.xlu1 %v2319_v26, %s2092_s23  ;;  %343 = vrot.lane.b32.xlu0 %v1658_v27, %s2092_s23 }
  0x4b   : > { %454 = vrot.lane.b32.xlu1 %v2326_v28, %s2093_s24  ;;  %438 = vrot.lane.b32.xlu0 %v1673_v29, %s2093_s24 }
  0x4f   : > { %746 = vrot.lane.b32.xlu1 %v2339_v30, %s2096_s5  ;;  %730 = vrot.lane.b32.xlu0 %v1674_v31, %s2096_s5 }
  0x53   : > { %844 = vrot.lane.b32.xlu1 %v2239_v10, %s2097_s6  ;;  %828 = vrot.lane.b32.xlu0 %v2242_v11, %s2097_s6 }
  0x57   : > { %456 = vrot.lane.b32.xlu1 %v2339_v30, %s2093_s24  ;;  %440 = vrot.lane.b32.xlu0 %v1674_v31, %s2093_s24 }
  0x5b   : > { %554 = vrot.lane.b32.xlu1 %v2239_v10, %s2804_s27  ;;  %538 = vrot.lane.b32.xlu0 %v2242_v11, %s2804_s27 }
  0x5f   : > { %846 = vrot.lane.b32.xlu1 %v2245_v12, %s2097_s6  ;;  %830 = vrot.lane.b32.xlu0 %v2248_v13, %s2097_s6 }
  0x63   : > { %941 = vrot.lane.b32.xlu1 %v1715_v32, %s2802_s8  ;;  %925 = vrot.lane.b32.xlu0 %v1707_v33, %s2802_s8 }
  0x67   : > { %556 = vrot.lane.b32.xlu1 %v2245_v12, %s2804_s27  ;;  %540 = vrot.lane.b32.xlu0 %v2248_v13, %s2804_s27  ;;  %s1777_s27 = sshll.u32 %s2078_s19, 5 }
  0x6b   : > { %651 = vrot.lane.b32.xlu1 %v1715_v32, %s2095_s30  ;;  %635 = vrot.lane.b32.xlu0 %v1707_v33, %s2095_s30 }
  0x6f   : > { %943 = vrot.lane.b32.xlu1 %v1716_v34, %s2802_s8  ;;  %927 = vrot.lane.b32.xlu0 %v1708_v35, %s2802_s8  ;;  %s1495_s8 = sadd.s32 %s1781_s10, %s1777_s27 }
  0x73   : > { %1038 = vrot.lane.b32.xlu1 %v1731_v36, %s2099_s13  ;;  %1022 = vrot.lane.b32.xlu0 %v1723_v37, %s2099_s13 }
  0x77   : > { %361 = vrot.lane.b32.xlu1 %v1715_v32, %s2092_s23  ;;  %345 = vrot.lane.b32.xlu0 %v1707_v33, %s2092_s23 }
  0x7b   : > { %653 = vrot.lane.b32.xlu1 %v1716_v34, %s2095_s30  ;;  %637 = vrot.lane.b32.xlu0 %v1708_v35, %s2095_s30 }
  0x7f   : > { %748 = vrot.lane.b32.xlu1 %v1731_v36, %s2096_s5  ;;  %732 = vrot.lane.b32.xlu0 %v1723_v37, %s2096_s5 }
  0x83   : > { %1040 = vrot.lane.b32.xlu1 %v1732_v45, %s2099_s13  ;;  %1024 = vrot.lane.b32.xlu0 %v1724_v46, %s2099_s13 }
  0x87   : > { %363 = vrot.lane.b32.xlu1 %v1716_v34, %s2092_s23  ;;  %347 = vrot.lane.b32.xlu0 %v1708_v35, %s2092_s23  ;;  %v1703_v35 = vld [vmem:[%s2204_s14 + $0xc0] sm:$0xff] }
  0x8b   : > { %458 = vrot.lane.b32.xlu1 %v1731_v36, %s2093_s24  ;;  %442 = vrot.lane.b32.xlu0 %v1723_v37, %s2093_s24 }
  0x8f   : > { %750 = vrot.lane.b32.xlu1 %v1732_v45, %s2096_s5  ;;  %734 = vrot.lane.b32.xlu0 %v1724_v46, %s2096_s5 }
  0x91   : > { %v340_v47 = vpop.permute.xlu1 %339  ;;  %v338_v48 = vpop.permute.xlu0 %337 }
  0x92   : > { %387 = vst.msk [vmem:[#allocation2 + $0x8] sm:$0xff] %vm385_vm2, %v340_v47  ;;  %386 = vst.msk [vmem:[#allocation2] sm:$0xff] %vm385_vm2, %v338_v48 }
  0x93   : > { %848 = vrot.lane.b32.xlu1 %v2269_v18, %s2097_s6  ;;  %832 = vrot.lane.b32.xlu0 %v2272_v19, %s2097_s6 }
  0x95   : > { %v356_v49 = vpop.permute.xlu1 %355  ;;  %v354_v50 = vpop.permute.xlu0 %353 }
  0x96   : > { %395 = vst.msk [vmem:[#allocation2 + $0x48] sm:$0xff] %vm385_vm2, %v356_v49  ;;  %394 = vst.msk [vmem:[#allocation2 + $0x40] sm:$0xff] %vm385_vm2, %v354_v50 }
  0x97   : > { %460 = vrot.lane.b32.xlu1 %v1732_v45, %s2093_s24  ;;  %444 = vrot.lane.b32.xlu0 %v1724_v46, %s2093_s24  ;;  %v1719_v45 = vld [vmem:[%s2204_s14 + $0xc1] sm:$0xff] }
  0x99   : > { %v451_v51 = vpop.permute.xlu1 %450  ;;  %v435_v52 = vpop.permute.xlu0 %434 }
  0x9a   : > { %491 = vst.msk [vmem:[#allocation2 + $0x40] sm:$0xff] %vm482_vm3, %v451_v51  ;;  %483 = vst.msk [vmem:[#allocation2] sm:$0xff] %vm482_vm3, %v435_v52  ;;  %v1720_v51 = vld [vmem:[%s2204_s14 + $0xc9] sm:$0xff] }
  0x9b   : > { %558 = vrot.lane.b32.xlu1 %v2269_v18, %s2808_s11  ;;  %542 = vrot.lane.b32.xlu0 %v2272_v19, %s2808_s11  ;;  %v1734_v19 = vld [vmem:[%s2204_s14 + $0xb2] sm:$0xff] }
  0x9d   : > { %v453_v53 = vpop.permute.xlu1 %452  ;;  %v437_v54 = vpop.permute.xlu0 %436 }
  0x9e   : > { %492 = vst.msk [vmem:[#allocation2 + $0x48] sm:$0xff] %vm482_vm3, %v453_v53  ;;  %484 = vst.msk [vmem:[#allocation2 + $0x8] sm:$0xff] %vm482_vm3, %v437_v54 }
  0x9f   : > { %850 = vrot.lane.b32.xlu1 %v2293_v22, %s2097_s6  ;;  %834 = vrot.lane.b32.xlu0 %v2296_v23, %s2097_s6 }
  0xa1   : > { %v551_v57 = vpop.permute.xlu1 %550  ;;  %v535_v58 = vpop.permute.xlu0 %534 }
  0xa2   : > { %591 = vst.msk [vmem:[#allocation2 + $0x40] sm:$0xff] %vm582_vm4, %v551_v57  ;;  %583 = vst.msk [vmem:[#allocation2] sm:$0xff] %vm582_vm4, %v535_v58 }
  0xa3   : > { %945 = vrot.lane.b32.xlu1 %v1717_v55, %s2809_s12  ;;  %929 = vrot.lane.b32.xlu0 %v1709_v56, %s2809_s12 }
  0xa5   : > { %v553_v59 = vpop.permute.xlu1 %552  ;;  %v537_v60 = vpop.permute.xlu0 %536 }
  0xa6   : > { %592 = vst.msk [vmem:[#allocation2 + $0x48] sm:$0xff] %vm582_vm4, %v553_v59  ;;  %584 = vst.msk [vmem:[#allocation2 + $0x8] sm:$0xff] %vm582_vm4, %v537_v60 }
  0xa7   : > { %560 = vrot.lane.b32.xlu1 %v2293_v22, %s2808_s11  ;;  %544 = vrot.lane.b32.xlu0 %v2296_v23, %s2808_s11  ;;  %v1726_v22 = vld [vmem:[%s2204_s14 + $0x52] sm:$0xff] }
  0xa9   : > { %v648_v61 = vpop.permute.xlu1 %647  ;;  %v632_v62 = vpop.permute.xlu0 %631 }
  0xaa   : > { %688 = vst.msk [vmem:[#allocation2 + $0x40] sm:$0xff] %vm679_vm5, %v648_v61  ;;  %680 = vst.msk [vmem:[#allocation2] sm:$0xff] %vm679_vm5, %v632_v62  ;;  %v1736_v61 = vld [vmem:[%s2204_s14 + $0xca] sm:$0xff] }
  0xab   : > { %655 = vrot.lane.b32.xlu1 %v1717_v55, %s2095_s30  ;;  %639 = vrot.lane.b32.xlu0 %v1709_v56, %s2095_s30 }
  0xad   : > { %v358_v1 = vpop.permute.xlu1 %357  ;;  %v342_v5 = vpop.permute.xlu0 %341 }
  0xae   : > { %396 = vst.msk [vmem:[#allocation2 + $0x50] sm:$0xff] %vm385_vm2, %v358_v1  ;;  %388 = vst.msk [vmem:[#allocation2 + $0x10] sm:$0xff] %vm385_vm2, %v342_v5  ;;  %v1705_v5 = vld [vmem:[%s2204_s14 + $0xd8] sm:$0xff] }
  0xaf   : > { %947 = vrot.lane.b32.xlu1 %v1718_v63, %s2809_s12  ;;  %931 = vrot.lane.b32.xlu0 %v1710_v0, %s2809_s12 }
  0xb1   : > { %v650_v10 = vpop.permute.xlu1 %649  ;;  %v634_v11 = vpop.permute.xlu0 %633 }
  0xb2   : > { %689 = vst.msk [vmem:[#allocation2 + $0x48] sm:$0xff] %vm679_vm5, %v650_v10  ;;  %681 = vst.msk [vmem:[#allocation2 + $0x8] sm:$0xff] %vm679_vm5, %v634_v11  ;;  %v1706_v10 = vld [vmem:[%s2204_s14 + $0xe0] sm:$0xff] }
  0xb3   : > { %1042 = vrot.lane.b32.xlu1 %v1733_v7, %s2099_s13  ;;  %1026 = vrot.lane.b32.xlu0 %v1725_v9, %s2099_s13 }
  0xb5   : > { %v745_v12 = vpop.permute.xlu1 %744  ;;  %v729_v13 = vpop.permute.xlu0 %728 }
  0xb6   : > { %785 = vst.msk [vmem:[#allocation2 + $0x40] sm:$0xff] %vm776_vm6, %v745_v12  ;;  %777 = vst.msk [vmem:[#allocation2] sm:$0xff] %vm776_vm6, %v729_v13 }
  0xb7   : > { %365 = vrot.lane.b32.xlu1 %v1717_v55, %s2092_s23  ;;  %349 = vrot.lane.b32.xlu0 %v1709_v56, %s2092_s23 }
  0xb9   : > { %v360_v15 = vpop.permute.xlu1 %359  ;;  %v344_v16 = vpop.permute.xlu0 %343 }
  0xba   : > { %397 = vst.msk [vmem:[#allocation2 + $0x58] sm:$0xff] %vm385_vm2, %v360_v15  ;;  %389 = vst.msk [vmem:[#allocation2 + $0x18] sm:$0xff] %vm385_vm2, %v344_v16 }
  0xbb   : > { %657 = vrot.lane.b32.xlu1 %v1718_v63, %s2095_s30  ;;  %641 = vrot.lane.b32.xlu0 %v1710_v0, %s2095_s30 }
  0xbd   : > { %v455_v17 = vpop.permute.xlu1 %454  ;;  %v439_v18 = vpop.permute.xlu0 %438 }
  0xbe   : > { %493 = vst.msk [vmem:[#allocation2 + $0x50] sm:$0xff] %vm482_vm3, %v455_v17  ;;  %485 = vst.msk [vmem:[#allocation2 + $0x10] sm:$0xff] %vm482_vm3, %v439_v18 }
  0xbf   : > { %752 = vrot.lane.b32.xlu1 %v1733_v7, %s2096_s5  ;;  %736 = vrot.lane.b32.xlu0 %v1725_v9, %s2096_s5 }
  0xc1   : > { %v747_v23 = vpop.permute.xlu1 %746  ;;  %v731_v25 = vpop.permute.xlu0 %730 }
  0xc2   : > { %786 = vst.msk [vmem:[#allocation2 + $0x48] sm:$0xff] %vm776_vm6, %v747_v23  ;;  %778 = vst.msk [vmem:[#allocation2 + $0x8] sm:$0xff] %vm776_vm6, %v731_v25 }
  0xc3   : > { %1044 = vrot.lane.b32.xlu1 %v1734_v19, %s2099_s13  ;;  %1028 = vrot.lane.b32.xlu0 %v1726_v22, %s2099_s13 }
  0xc5   : > { %v845_v27 = vpop.permute.xlu1 %844  ;;  %v829_v29 = vpop.permute.xlu0 %828 }
  0xc6   : > { %885 = vst.msk [vmem:[#allocation2 + $0x40] sm:$0xff] %vm876_vm7, %v845_v27  ;;  %877 = vst.msk [vmem:[#allocation2] sm:$0xff] %vm876_vm7, %v829_v29 }
  0xc7   : > { %367 = vrot.lane.b32.xlu1 %v1718_v63, %s2092_s23  ;;  %351 = vrot.lane.b32.xlu0 %v1710_v0, %s2092_s23 }
  0xc9   : > { %v457_v31 = vpop.permute.xlu1 %456  ;;  %v441_v32 = vpop.permute.xlu0 %440 }
  0xca   : > { %494 = vst.msk [vmem:[#allocation2 + $0x58] sm:$0xff] %vm482_vm3, %v457_v31  ;;  %486 = vst.msk [vmem:[#allocation2 + $0x18] sm:$0xff] %vm482_vm3, %v441_v32 }
  0xcb   : > { %462 = vrot.lane.b32.xlu1 %v1733_v7, %s2093_s24  ;;  %446 = vrot.lane.b32.xlu0 %v1725_v9, %s2093_s24 }
  0xcd   : > { %v555_v33 = vpop.permute.xlu1 %554  ;;  %v539_v34 = vpop.permute.xlu0 %538 }
  0xce   : > { %593 = vst.msk [vmem:[#allocation2 + $0x50] sm:$0xff] %vm582_vm4, %v555_v33  ;;  %585 = vst.msk [vmem:[#allocation2 + $0x10] sm:$0xff] %vm582_vm4, %v539_v34 }
  0xcf   : > { %754 = vrot.lane.b32.xlu1 %v1734_v19, %s2096_s5  ;;  %738 = vrot.lane.b32.xlu0 %v1726_v22, %s2096_s5 }
  0xd1   : > { %v847_v36 = vpop.permute.xlu1 %846  ;;  %v831_v37 = vpop.permute.xlu0 %830 }
  0xd2   : > { %886 = vst.msk [vmem:[#allocation2 + $0x48] sm:$0xff] %vm876_vm7, %v847_v36  ;;  %878 = vst.msk [vmem:[#allocation2 + $0x8] sm:$0xff] %vm876_vm7, %v831_v37 }
  0xd3   : > { %852 = vrot.lane.b32.xlu1 %v1703_v35, %s2097_s6  ;;  %836 = vrot.lane.b32.xlu0 %v2282_v21, %s2097_s6 }
  0xd5   : > { %v942_v38 = vpop.permute.xlu1 %941  ;;  %v926_v39 = vpop.permute.xlu0 %925 }
  0xd6   : > { %982 = vst.msk [vmem:[#allocation2 + $0x40] sm:$0xff] %vm973_vm8, %v942_v38  ;;  %974 = vst.msk [vmem:[#allocation2] sm:$0xff] %vm973_vm8, %v926_v39 }
  0xd7   : > { %464 = vrot.lane.b32.xlu1 %v1734_v19, %s2093_s24  ;;  %448 = vrot.lane.b32.xlu0 %v1726_v22, %s2093_s24 }
  0xd9   : > { %v557_v40 = vpop.permute.xlu1 %556  ;;  %v541_v41 = vpop.permute.xlu0 %540 }
  0xda   : > { %594 = vst.msk [vmem:[#allocation2 + $0x58] sm:$0xff] %vm582_vm4, %v557_v40  ;;  %586 = vst.msk [vmem:[#allocation2 + $0x18] sm:$0xff] %vm582_vm4, %v541_v41 }
  0xdb   : > { %562 = vrot.lane.b32.xlu1 %v1703_v35, %s2808_s11  ;;  %546 = vrot.lane.b32.xlu0 %v2282_v21, %s2808_s11 }
  0xdd   : > { %v652_v43 = vpop.permute.xlu1 %651  ;;  %v636_v44 = vpop.permute.xlu0 %635 }
  0xde   : > { %690 = vst.msk [vmem:[#allocation2 + $0x50] sm:$0xff] %vm679_vm5, %v652_v43  ;;  %682 = vst.msk [vmem:[#allocation2 + $0x10] sm:$0xff] %vm679_vm5, %v636_v44 }
  0xdf   : > { %854 = vrot.lane.b32.xlu1 %v1704_v42, %s2097_s6  ;;  %838 = vrot.lane.b32.xlu0 %v2279_v20, %s2097_s6 }
  0xe1   : > { %v944_v46 = vpop.permute.xlu1 %943  ;;  %v928_v47 = vpop.permute.xlu0 %927 }
  0xe2   : > { %983 = vst.msk [vmem:[#allocation2 + $0x48] sm:$0xff] %vm973_vm8, %v944_v46  ;;  %975 = vst.msk [vmem:[#allocation2 + $0x8] sm:$0xff] %vm973_vm8, %v928_v47 }
  0xe3   : > { %949 = vrot.lane.b32.xlu1 %v1719_v45, %s2809_s12  ;;  %933 = vrot.lane.b32.xlu0 %v2214_v3, %s2809_s12 }
  0xe5   : > { %v1039_v21 = vpop.permute.xlu1 %1038  ;;  %v1023_v48 = vpop.permute.xlu0 %1022 }
  0xe6   : > { %1079 = vst.msk [vmem:[#allocation2 + $0x40] sm:$0xff] %vm1070_vm9, %v1039_v21  ;;  %1071 = vst.msk [vmem:[#allocation2] sm:$0xff] %vm1070_vm9, %v1023_v48 }
  0xe7   : > { %564 = vrot.lane.b32.xlu1 %v1704_v42, %s2808_s11  ;;  %548 = vrot.lane.b32.xlu0 %v2279_v20, %s2808_s11  ;;  %s1778_s11 = sshll.u32 %s1495_s8, 7 }
  0xe8   : > { %s2735_s18 = scalar_lea.hbm %s2801_s4, %s1778_s11 }
  0xe9   : > { %v362_v49 = vpop.permute.xlu1 %361  ;;  %v346_v50 = vpop.permute.xlu0 %345 }
  0xea   : > { %398 = vst.msk [vmem:[#allocation2 + $0x60] sm:$0xff] %vm385_vm2, %v362_v49  ;;  %390 = vst.msk [vmem:[#allocation2 + $0x20] sm:$0xff] %vm385_vm2, %v346_v50 }
  0xeb   : > { %659 = vrot.lane.b32.xlu1 %v1719_v45, %s2095_s30  ;;  %643 = vrot.lane.b32.xlu0 %v2214_v3, %s2095_s30  ;;  %v1735_v3 = vld [vmem:[%s2204_s14 + $0xc2] sm:$0xff] }
  0xed   : > { %v654_v52 = vpop.permute.xlu1 %653  ;;  %v638_v53 = vpop.permute.xlu0 %637  ;;  %v1087_v54 = vld [vmem:[#allocation2] sm:$0xff] }
  0xee   : > { %v1095_v55 = vld [vmem:[#allocation2 + $0x40] sm:$0xff]  ;;  %691 = vst.msk [vmem:[#allocation2 + $0x58] sm:$0xff] %vm679_vm5, %v654_v52  ;;  %683 = vst.msk [vmem:[#allocation2 + $0x18] sm:$0xff] %vm679_vm5, %v638_v53  ;;  %1813 = vmatprep.mubr.msk.f32.mxu0 %vm1108_vm10, %v1087_v54 }
  0xef   : > { %1825 = vmatprep.mubr.msk.f32.mxu1 %vm1108_vm10, %v1095_v55  ;;  %951 = vrot.lane.b32.xlu1 %v1720_v51, %s2809_s12 }
  0xf0   : > { %935 = vrot.lane.b32.xlu0 %v2211_v2, %s2809_s12 }
  0xf1   : > { %v749_v20 = vpop.permute.xlu1 %748  ;;  %v733_v56 = vpop.permute.xlu0 %732 }
  0xf2   : > { %787 = vst.msk [vmem:[#allocation2 + $0x50] sm:$0xff] %vm776_vm6, %v749_v20  ;;  %779 = vst.msk [vmem:[#allocation2 + $0x10] sm:$0xff] %vm776_vm6, %v733_v56 }
  0xf3   : > { %1046 = vrot.lane.b32.xlu1 %v1735_v3, %s2099_s13 }
  0xf4   : > { %1030 = vrot.lane.b32.xlu0 %v2235_v8, %s2099_s13 }
  0xf5   : > { %v1041_v57 = vpop.permute.xlu1 %1040  ;;  %v1025_v58 = vpop.permute.xlu0 %1024 }
  0xf6   : > { %1080 = vst.msk [vmem:[#allocation2 + $0x48] sm:$0xff] %vm1070_vm9, %v1041_v57  ;;  %1072 = vst.msk [vmem:[#allocation2 + $0x8] sm:$0xff] %vm1070_vm9, %v1025_v58 }
  0xf7   : > { %661 = vrot.lane.b32.xlu1 %v1720_v51, %s2095_s30 }
  0xf8   : > { %645 = vrot.lane.b32.xlu0 %v2211_v2, %s2095_s30 }
  0xf9   : > { %v364_v59 = vpop.permute.xlu1 %363  ;;  %v348_v60 = vpop.permute.xlu0 %347 }
  0xfa   : > { %399 = vst.msk [vmem:[#allocation2 + $0x68] sm:$0xff] %vm385_vm2, %v364_v59  ;;  %391 = vst.msk [vmem:[#allocation2 + $0x28] sm:$0xff] %vm385_vm2, %v348_v60 }
  0xfb   : > { %756 = vrot.lane.b32.xlu1 %v1735_v3, %s2096_s5 }
  0xfc   : > { %740 = vrot.lane.b32.xlu0 %v2235_v8, %s2096_s5 }
  0xfd   : > { %v459_v62 = vpop.permute.xlu1 %458  ;;  %v443_v63 = vpop.permute.xlu0 %442  ;;  %v1088_v0 = vld [vmem:[#allocation2 + $0x8] sm:$0xff] }
  0xfe   : > { %v1096_v1 = vld [vmem:[#allocation2 + $0x48] sm:$0xff]  ;;  %495 = vst.msk [vmem:[#allocation2 + $0x60] sm:$0xff] %vm482_vm3, %v459_v62  ;;  %487 = vst.msk [vmem:[#allocation2 + $0x20] sm:$0xff] %vm482_vm3, %v443_v63  ;;  %1814 = vmatmul.mubr.msk.f32.vlgmr.msra.gmra.mrb[0].mxu0 %vm1108_vm10, %v1088_v0 }
  0xff   : > { %1826 = vmatmul.mubr.msk.f32.vlgmr.msra.gmra.mrb[0].mxu1 %vm1108_vm10, %v1096_v1  ;;  %1048 = vrot.lane.b32.xlu1 %v1736_v61, %s2099_s13 }
 0x100   : > { %1032 = vrot.lane.b32.xlu0 %v2262_v14, %s2099_s13 }
 0x101   : > { %v751_v2 = vpop.permute.xlu1 %750  ;;  %v735_v8 = vpop.permute.xlu0 %734 }
 0x102   : > { %788 = vst.msk [vmem:[#allocation2 + $0x58] sm:$0xff] %vm776_vm6, %v751_v2  ;;  %780 = vst.msk [vmem:[#allocation2 + $0x18] sm:$0xff] %vm776_vm6, %v735_v8 }
 0x103   : > { %758 = vrot.lane.b32.xlu1 %v1736_v61, %s2096_s5 }
 0x104   : > { %742 = vrot.lane.b32.xlu0 %v2262_v14, %s2096_s5  ;;  %v1721_v14 = vld [vmem:[%s2204_s14 + $0xd9] sm:$0xff]  ;;  %s2100_s5 = smov [#allocation3]  }
 0x105   : > { %v849_v7 = vpop.permute.xlu1 %848  ;;  %v833_v9 = vpop.permute.xlu0 %832 }
 0x106   : > { %887 = vst.msk [vmem:[#allocation2 + $0x50] sm:$0xff] %vm876_vm7, %v849_v7  ;;  %879 = vst.msk [vmem:[#allocation2 + $0x10] sm:$0xff] %vm876_vm7, %v833_v9 }
 0x107   : > { %856 = vrot.lane.b32.xlu1 %v1705_v5, %s2097_s6 }
 0x108   : > { %840 = vrot.lane.b32.xlu0 %v2217_v4, %s2097_s6  ;;  %v1722_v4 = vld [vmem:[%s2204_s14 + $0xe1] sm:$0xff] }
 0x109   : > { %v461_v11 = vpop.permute.xlu1 %460  ;;  %v445_v12 = vpop.permute.xlu0 %444 }
 0x10a   : > { %496 = vst.msk [vmem:[#allocation2 + $0x68] sm:$0xff] %vm482_vm3, %v461_v11  ;;  %488 = vst.msk [vmem:[#allocation2 + $0x28] sm:$0xff] %vm482_vm3, %v445_v12 }
 0x10b   : > { %858 = vrot.lane.b32.xlu1 %v1706_v10, %s2097_s6 }
 0x10c   : > { %842 = vrot.lane.b32.xlu0 %v2221_v6, %s2097_s6  ;;  %v1737_v6 = vld [vmem:[%s2204_s14 + $0xda] sm:$0xff]  ;;  %s246_s6 = sand.u32 1, %s2066_s16  }
 0x10d   : > { %v559_v13 = vpop.permute.xlu1 %558  ;;  %v543_v15 = vpop.permute.xlu0 %542  ;;  %s2744_s19 = scalar_lea.sflag [#allocation4], %s246_s6 }
 0x10e   : > { %595 = vst.msk [vmem:[#allocation2 + $0x60] sm:$0xff] %vm582_vm4, %v559_v13  ;;  %587 = vst.msk [vmem:[#allocation2 + $0x20] sm:$0xff] %vm582_vm4, %v543_v15 }
 0x10f   : > { %953 = vrot.lane.b32.xlu1 %v1721_v14, %s2809_s12 }
 0x110   : > { %937 = vrot.lane.b32.xlu0 %v2309_v24, %s2809_s12  ;;  %v1738_v24 = vld [vmem:[%s2204_s14 + $0xe2] sm:$0xff] }
 0x111   : > { %v851_v16 = vpop.permute.xlu1 %850  ;;  %v835_v17 = vpop.permute.xlu0 %834 }
 0x112   : > { %888 = vst.msk [vmem:[#allocation2 + $0x58] sm:$0xff] %vm876_vm7, %v851_v16  ;;  %880 = vst.msk [vmem:[#allocation2 + $0x18] sm:$0xff] %vm876_vm7, %v835_v17 }
 0x113   : > { %955 = vrot.lane.b32.xlu1 %v1722_v4, %s2809_s12 }
 0x114   : > { %939 = vrot.lane.b32.xlu0 %v2319_v26, %s2809_s12 }
 0x115   : > { %v946_v18 = vpop.permute.xlu1 %945  ;;  %v930_v19 = vpop.permute.xlu0 %929 }
 0x116   : > { %984 = vst.msk [vmem:[#allocation2 + $0x50] sm:$0xff] %vm973_vm8, %v946_v18  ;;  %976 = vst.msk [vmem:[#allocation2 + $0x10] sm:$0xff] %vm973_vm8, %v930_v19 }
 0x117   : > { %1050 = vrot.lane.b32.xlu1 %v1737_v6, %s2099_s13 }
 0x118   : > { %1034 = vrot.lane.b32.xlu0 %v2326_v28, %s2099_s13 }
 0x119   : > { %v561_v22 = vpop.permute.xlu1 %560  ;;  %v545_v23 = vpop.permute.xlu0 %544 }
 0x11a   : > { %596 = vst.msk [vmem:[#allocation2 + $0x68] sm:$0xff] %vm582_vm4, %v561_v22  ;;  %588 = vst.msk [vmem:[#allocation2 + $0x28] sm:$0xff] %vm582_vm4, %v545_v23 }
 0x11b   : > { %1052 = vrot.lane.b32.xlu1 %v1738_v24, %s2099_s13 }
 0x11c   : > { %1036 = vrot.lane.b32.xlu0 %v2339_v30, %s2099_s13  ;;  %s1635_s13 = sshll.u32 %s246_s6, 7 }
 0x11d   : > { %v656_v26 = vpop.permute.xlu1 %655  ;;  %v640_v25 = vpop.permute.xlu0 %639  ;;  %s2690_s9 = scalar_lea.vmem [#allocation3], %s1635_s13  ;;  %s2000_s13 = sshll.u32 %s2100_s5, 4  ;;  %s2001_s13 = int_to_ptr.vmem [resolvable:$false] %s2000_s13 }
 0x11e   : > { %692 = vst.msk [vmem:[#allocation2 + $0x60] sm:$0xff] %vm679_vm5, %v656_v26  ;;  %684 = vst.msk [vmem:[#allocation2 + $0x20] sm:$0xff] %vm679_vm5, %v640_v25  ;;  %s1498_s12 = sshll.u32 %s2690_s9, 4  ;;  %s2002_s10 = scalar_lea.vmem %s2001_s13, 4096  ;;  %s2738_s12 = int_to_ptr.vmem [resolvable:$true] %s1498_s12 }
 0x11f   : > { %s1996_s30 = scalar_lea.vmem %s2738_s12, 2048  ;;  %p2003_p2 = scmp.lt.s32.totalorder %s2738_s12, %s2001_s13 }
 0x120   : > { %p1997_p13 = scmp.ne.s32.totalorder %s2738_s12, %s1996_s30  ;;  %p2004_p4 = scmp.lt.s32.totalorder %s2002_s10, %s1996_s30 }
 0x121   : > { %v948_v27 = vpop.permute.xlu1 %947  ;;  %v932_v28 = vpop.permute.xlu0 %931 }
 0x122   : > { %985 = vst.msk [vmem:[#allocation2 + $0x58] sm:$0xff] %vm973_vm8, %v948_v27  ;;  %977 = vst.msk [vmem:[#allocation2 + $0x18] sm:$0xff] %vm973_vm8, %v932_v28  ;;  %p1998_p0 = pnand %p1997_p13, %p2178_p3  ;;  %p2005_p5 = por %p2004_p4, %p2003_p2 }
 0x124   : > { %p1999_p1 = pneg %p1998_p0 }
 0x125   : > { %v1043_v29 = vpop.permute.xlu1 %1042  ;;  %v1027_v31 = vpop.permute.xlu0 %1026 }
 0x126   : > { %1081 = vst.msk [vmem:[#allocation2 + $0x50] sm:$0xff] %vm1070_vm9, %v1043_v29  ;;  %1073 = vst.msk [vmem:[#allocation2 + $0x10] sm:$0xff] %vm1070_vm9, %v1027_v31  ;;  %p2006_p6 = pnand %p2005_p5, %p1999_p1 }
 0x129   : > { %v366_v32 = vpop.permute.xlu1 %365  ;;  %v350_v30 = vpop.permute.xlu0 %349 }
 0x12a   : > { %400 = vst.msk [vmem:[#allocation2 + $0x70] sm:$0xff] %vm385_vm2, %v366_v32  ;;  %392 = vst.msk [vmem:[#allocation2 + $0x30] sm:$0xff] %vm385_vm2, %v350_v30  ;;  %v2672_v32 = vld [vmem:[%s2799_s2] ss:$0 sm:$0xff] }
 0x12d   : > { %v658_v33 = vpop.permute.xlu1 %657  ;;  %v642_v34 = vpop.permute.xlu0 %641  ;;  %v1089_v35 = vld [vmem:[#allocation2 + $0x10] sm:$0xff] }
 0x12e   : > { %v1097_v36 = vld [vmem:[#allocation2 + $0x50] sm:$0xff]  ;;  %693 = vst.msk [vmem:[#allocation2 + $0x68] sm:$0xff] %vm679_vm5, %v658_v33  ;;  %685 = vst.msk [vmem:[#allocation2 + $0x28] sm:$0xff] %vm679_vm5, %v642_v34  ;;  %1816 = vmatprep.mubr.msk.f32.mxu0 %vm1108_vm10, %v1089_v35  ;;  %v2677_v33 = vld [vmem:[%s2800_s3] ss:$0 sm:$0xff] }
 0x12f   : > { %1828 = vmatprep.mubr.msk.f32.mxu1 %vm1108_vm10, %v1097_v36 }
 0x131   : > { %v753_v37 = vpop.permute.xlu1 %752  ;;  %v737_v38 = vpop.permute.xlu0 %736 }
 0x132   : > { %789 = vst.msk [vmem:[#allocation2 + $0x60] sm:$0xff] %vm776_vm6, %v753_v37  ;;  %781 = vst.msk [vmem:[#allocation2 + $0x20] sm:$0xff] %vm776_vm6, %v737_v38 }
 0x135   : > { %v1045_v39 = vpop.permute.xlu1 %1044  ;;  %v1029_v40 = vpop.permute.xlu0 %1028 }
 0x136   : > { %1082 = vst.msk [vmem:[#allocation2 + $0x58] sm:$0xff] %vm1070_vm9, %v1045_v39  ;;  %1074 = vst.msk [vmem:[#allocation2 + $0x18] sm:$0xff] %vm1070_vm9, %v1029_v40 }
 0x139   : > { %v368_v41 = vpop.permute.xlu1 %367  ;;  %v352_v42 = vpop.permute.xlu0 %351 }
 0x13a   : > { %401 = vst.msk [vmem:[#allocation2 + $0x78] sm:$0xff] %vm385_vm2, %v368_v41  ;;  %393 = vst.msk [vmem:[#allocation2 + $0x38] sm:$0xff] %vm385_vm2, %v352_v42 }
 0x13d   : > { %v463_v43 = vpop.permute.xlu1 %462  ;;  %v447_v44 = vpop.permute.xlu0 %446  ;;  %v1090_v45 = vld [vmem:[#allocation2 + $0x18] sm:$0xff] }
 0x13e   : > { %v1098_v46 = vld [vmem:[#allocation2 + $0x58] sm:$0xff]  ;;  %497 = vst.msk [vmem:[#allocation2 + $0x70] sm:$0xff] %vm482_vm3, %v463_v43  ;;  %489 = vst.msk [vmem:[#allocation2 + $0x30] sm:$0xff] %vm482_vm3, %v447_v44  ;;  %1817 = vmatmul.mubr.msk.f32.gmra.mrb[2].mxu0 %vm1108_vm10, %v1090_v45 }
 0x13f   : > { %1829 = vmatmul.mubr.msk.f32.gmra.mrb[2].mxu1 %vm1108_vm10, %v1098_v46 }
 0x141   : > { %v755_v47 = vpop.permute.xlu1 %754  ;;  %v739_v21 = vpop.permute.xlu0 %738 }
 0x142   : > { %790 = vst.msk [vmem:[#allocation2 + $0x68] sm:$0xff] %vm776_vm6, %v755_v47  ;;  %782 = vst.msk [vmem:[#allocation2 + $0x28] sm:$0xff] %vm776_vm6, %v739_v21 }
 0x145   : > { %v853_v48 = vpop.permute.xlu1 %852  ;;  %v837_v49 = vpop.permute.xlu0 %836 }
 0x146   : > { %889 = vst.msk [vmem:[#allocation2 + $0x60] sm:$0xff] %vm876_vm7, %v853_v48  ;;  %881 = vst.msk [vmem:[#allocation2 + $0x20] sm:$0xff] %vm876_vm7, %v837_v49 }
 0x149   : > { %v465_v50 = vpop.permute.xlu1 %464  ;;  %v449_v51 = vpop.permute.xlu0 %448 }
 0x14a   : > { %498 = vst.msk [vmem:[#allocation2 + $0x78] sm:$0xff] %vm482_vm3, %v465_v50  ;;  %490 = vst.msk [vmem:[#allocation2 + $0x38] sm:$0xff] %vm482_vm3, %v449_v51 }
 0x14d   : > { %v563_v52 = vpop.permute.xlu1 %562  ;;  %v547_v53 = vpop.permute.xlu0 %546 }
 0x14e   : > { %597 = vst.msk [vmem:[#allocation2 + $0x70] sm:$0xff] %vm582_vm4, %v563_v52  ;;  %589 = vst.msk [vmem:[#allocation2 + $0x30] sm:$0xff] %vm582_vm4, %v547_v53 }
 0x151   : > { %v855_v54 = vpop.permute.xlu1 %854  ;;  %v839_v55 = vpop.permute.xlu0 %838 }
 0x152   : > { %890 = vst.msk [vmem:[#allocation2 + $0x68] sm:$0xff] %vm876_vm7, %v855_v54  ;;  %882 = vst.msk [vmem:[#allocation2 + $0x28] sm:$0xff] %vm876_vm7, %v839_v55 }
 0x155   : > { %v950_v3 = vpop.permute.xlu1 %949  ;;  %v934_v20 = vpop.permute.xlu0 %933 }
 0x156   : > { %986 = vst.msk [vmem:[#allocation2 + $0x60] sm:$0xff] %vm973_vm8, %v950_v3  ;;  %978 = vst.msk [vmem:[#allocation2 + $0x20] sm:$0xff] %vm973_vm8, %v934_v20 }
 0x159   : > { %v565_v56 = vpop.permute.xlu1 %564  ;;  %v549_v57 = vpop.permute.xlu0 %548 }
 0x15a   : > { %598 = vst.msk [vmem:[#allocation2 + $0x78] sm:$0xff] %vm582_vm4, %v565_v56  ;;  %590 = vst.msk [vmem:[#allocation2 + $0x38] sm:$0xff] %vm582_vm4, %v549_v57 }
 0x15d   : > { %v660_v58 = vpop.permute.xlu1 %659  ;;  %v644_v59 = vpop.permute.xlu0 %643 }
 0x15e   : > { %694 = vst.msk [vmem:[#allocation2 + $0x70] sm:$0xff] %vm679_vm5, %v660_v58  ;;  %686 = vst.msk [vmem:[#allocation2 + $0x30] sm:$0xff] %vm679_vm5, %v644_v59 }
 0x161   : > { %v952_v60 = vpop.permute.xlu1 %951 }
 0x162   : > { %v936_v61 = vpop.permute.xlu0 %935  ;;  %987 = vst.msk [vmem:[#allocation2 + $0x68] sm:$0xff] %vm973_vm8, %v952_v60 }
 0x163   : > { %979 = vst.msk [vmem:[#allocation2 + $0x28] sm:$0xff] %vm973_vm8, %v936_v61 }
 0x165   : > { %v1047_v62 = vpop.permute.xlu1 %1046 }
 0x166   : > { %v1031_v63 = vpop.permute.xlu0 %1030  ;;  %1083 = vst.msk [vmem:[#allocation2 + $0x60] sm:$0xff] %vm1070_vm9, %v1047_v62 }
 0x167   : > { %1075 = vst.msk [vmem:[#allocation2 + $0x20] sm:$0xff] %vm1070_vm9, %v1031_v63 }
 0x169   : > { %v662_v0 = vpop.permute.xlu1 %661 }
 0x16a   : > { %v646_v1 = vpop.permute.xlu0 %645  ;;  %695 = vst.msk [vmem:[#allocation2 + $0x78] sm:$0xff] %vm679_vm5, %v662_v0 }
 0x16b   : > { %687 = vst.msk [vmem:[#allocation2 + $0x38] sm:$0xff] %vm679_vm5, %v646_v1 }
 0x16d   : > { %v757_v2 = vpop.permute.xlu1 %756  ;;  %v1099_v7 = vld [vmem:[#allocation2 + $0x60] sm:$0xff] }
 0x16e   : > { %v741_v8 = vpop.permute.xlu0 %740  ;;  %v1091_v5 = vld [vmem:[#allocation2 + $0x20] sm:$0xff]  ;;  %791 = vst.msk [vmem:[#allocation2 + $0x70] sm:$0xff] %vm776_vm6, %v757_v2  ;;  %1831 = vmatprep.mubr.msk.f32.mxu1 %vm1108_vm10, %v1099_v7 }
 0x16f   : > { %783 = vst.msk [vmem:[#allocation2 + $0x30] sm:$0xff] %vm776_vm6, %v741_v8  ;;  %1819 = vmatprep.mubr.msk.f32.mxu0 %vm1108_vm10, %v1091_v5 }
 0x171   : > { %v1049_v9 = vpop.permute.xlu1 %1048 }
 0x172   : > { %v1033_v10 = vpop.permute.xlu0 %1032  ;;  %1084 = vst.msk [vmem:[#allocation2 + $0x68] sm:$0xff] %vm1070_vm9, %v1049_v9 }
 0x173   : > { %1076 = vst.msk [vmem:[#allocation2 + $0x28] sm:$0xff] %vm1070_vm9, %v1033_v10 }
 0x175   : > { %v759_v11 = vpop.permute.xlu1 %758 }
 0x176   : > { %v743_v12 = vpop.permute.xlu0 %742  ;;  %792 = vst.msk [vmem:[#allocation2 + $0x78] sm:$0xff] %vm776_vm6, %v759_v11 }
 0x177   : > { %784 = vst.msk [vmem:[#allocation2 + $0x38] sm:$0xff] %vm776_vm6, %v743_v12 }
 0x179   : > { %v857_v14 = vpop.permute.xlu1 %856  ;;  %v1100_v4 = vld [vmem:[#allocation2 + $0x68] sm:$0xff] }
 0x17a   : > { %v841_v13 = vpop.permute.xlu0 %840  ;;  %v1092_v15 = vld [vmem:[#allocation2 + $0x28] sm:$0xff]  ;;  %891 = vst.msk [vmem:[#allocation2 + $0x70] sm:$0xff] %vm876_vm7, %v857_v14  ;;  %1832 = vmatmul.mubr.msk.f32.gmra.mrb[4].mxu1 %vm1108_vm10, %v1100_v4 }
 0x17b   : > { %883 = vst.msk [vmem:[#allocation2 + $0x30] sm:$0xff] %vm876_vm7, %v841_v13  ;;  %1820 = vmatmul.mubr.msk.f32.gmra.mrb[4].mxu0 %vm1108_vm10, %v1092_v15 }
 0x17d   : > { %v859_v16 = vpop.permute.xlu1 %858 }
 0x17e   : > { %v843_v17 = vpop.permute.xlu0 %842  ;;  %892 = vst.msk [vmem:[#allocation2 + $0x78] sm:$0xff] %vm876_vm7, %v859_v16 }
 0x17f   : > { %884 = vst.msk [vmem:[#allocation2 + $0x38] sm:$0xff] %vm876_vm7, %v843_v17 }
 0x181   : > { %v954_v6 = vpop.permute.xlu1 %953 }
 0x182   : > { %v938_v18 = vpop.permute.xlu0 %937  ;;  %988 = vst.msk [vmem:[#allocation2 + $0x70] sm:$0xff] %vm973_vm8, %v954_v6 }
 0x183   : > { %980 = vst.msk [vmem:[#allocation2 + $0x30] sm:$0xff] %vm973_vm8, %v938_v18 }
 0x185   : > { %v956_v19 = vpop.permute.xlu1 %955 }
 0x186   : > { %v940_v24 = vpop.permute.xlu0 %939  ;;  %989 = vst.msk [vmem:[#allocation2 + $0x78] sm:$0xff] %vm973_vm8, %v956_v19 }
 0x187   : > { %981 = vst.msk [vmem:[#allocation2 + $0x38] sm:$0xff] %vm973_vm8, %v940_v24 }
 0x189   : > { %v1051_v22 = vpop.permute.xlu1 %1050 }
 0x18a   : > { %v1035_v23 = vpop.permute.xlu0 %1034  ;;  %1085 = vst.msk [vmem:[#allocation2 + $0x70] sm:$0xff] %vm1070_vm9, %v1051_v22 }
 0x18b   : > { %1077 = vst.msk [vmem:[#allocation2 + $0x30] sm:$0xff] %vm1070_vm9, %v1035_v23 }
 0x18d   : > { %v1053_v26 = vpop.permute.xlu1 %1052 }
 0x18e   : > { %v1037_v25 = vpop.permute.xlu0 %1036  ;;  %1086 = vst.msk [vmem:[#allocation2 + $0x78] sm:$0xff] %vm1070_vm9, %v1053_v26 }
 0x18f   : > { %1078 = vst.msk [vmem:[#allocation2 + $0x38] sm:$0xff] %vm1070_vm9, %v1037_v25 }
 0x191   : > { %v1101_v28 = vld [vmem:[#allocation2 + $0x70] sm:$0xff] }
 0x192   : > { %v1093_v27 = vld [vmem:[#allocation2 + $0x30] sm:$0xff]  ;;  %1834 = vmatprep.mubr.msk.f32.mxu1 %vm1108_vm10, %v1101_v28 }
 0x193   : > { %1822 = vmatprep.mubr.msk.f32.mxu0 %vm1108_vm10, %v1093_v27 }
 0x195   : > { %v1102_v31 = vld [vmem:[#allocation2 + $0x78] sm:$0xff] }
 0x196   : > { %v1094_v29 = vld [vmem:[#allocation2 + $0x38] sm:$0xff]  ;;  %1835 = vmatmul.mubr.msk.f32.gmra.mrb[6].mxu1 %vm1108_vm10, %v1102_v31 }
 0x197   : > { %1823 = vmatmul.mubr.msk.f32.gmra.mrb[6].mxu0 %vm1108_vm10, %v1094_v29 }
 0x1d1   : > { %v1815_v30 = vpop.f32.mrb[0].mxu0 }
 0x1d2   : > { %v1827_v34 = vpop.f32.mrb[0].mxu1  ;;  %v1314_v35 = vmul.f32 %v1815_v30, %v2672_v32  ;;  %v1227_v37 = vpop.f32.mrb[1].mxu0 }
 0x1d3   : > { %v1322_v36 = vmul.f32 %v1827_v34, %v2672_v32  ;;  %v1267_v38 = vpop.f32.mrb[1].mxu1  ;;  %v1313_v39 = vmul.f32 %v2672_v32, %v1227_v37 }
 0x1d4   : > { %v1321_v40 = vmul.f32 %v2672_v32, %v1267_v38  ;;  %v1337_v41 = vadd.f32 %v2677_v33, %v1314_v35 }
 0x1d5   : > { %v1345_v42 = vadd.f32 %v2677_v33, %v1322_v36  ;;  %v1336_v43 = vadd.f32 %v2677_v33, %v1313_v39 }
 0x1d6   : > { %v1344_v44 = vadd.f32 %v2677_v33, %v1321_v40  ;;  %v1759_v45 = vmul.f32 -1.442695, %v1337_v41 }
 0x1d7   : > { %v1767_v46 = vmul.f32 -1.442695, %v1345_v42  ;;  %v1758_v47 = vmul.f32 -1.442695, %v1336_v43 }
 0x1d8   : > { %v1766_v21 = vmul.f32 -1.442695, %v1344_v44  ;;  %1932 = vpow2.f32 %v1759_v45 }
 0x1d9   : > { %1934 = vpow2.f32 %v1767_v46 }
 0x1da   : > { %1936 = vpow2.f32 %v1758_v47 }
 0x1db   : > { %1938 = vpow2.f32 %v1766_v21 }
 0x1e2   : > { %v1933_v48 = vpop.eup %1932 }
 0x1e3   : > { %v1935_v49 = vpop.eup %1934  ;;  %v1401_v50 = vadd.f32 1.0, %v1933_v48 }
 0x1e4   : > { %v1937_v51 = vpop.eup %1936  ;;  %v1409_v52 = vadd.f32 1.0, %v1935_v49 }
 0x1e5   : > { %v1939_v53 = vpop.eup %1938  ;;  %1940 = vrcp.f32 %v1401_v50  ;;  %v1400_v54 = vadd.f32 1.0, %v1937_v51 }
 0x1e6   : > { %1942 = vrcp.f32 %v1409_v52  ;;  %v1408_v55 = vadd.f32 1.0, %v1939_v53 }
 0x1e7   : > { %1944 = vrcp.f32 %v1400_v54 }
 0x1e8   : > { %1946 = vrcp.f32 %v1408_v55 }
 0x1ef   : > { %v1941_v3 = vpop.eup %1940 }
 0x1f0   : > { %v1943_v20 = vpop.eup %1942  ;;  %v1449_v56 = vmul.f32 %v1941_v3, %v1337_v41 }
 0x1f1   : > { %v1945_v57 = vpop.eup %1944  ;;  %v1457_v58 = vmul.f32 %v1943_v20, %v1345_v42 }
 0x1f2   : > { %v1947_v59 = vpop.eup %1946  ;;  %1465 = vst [vmem:[%s2690_s9 + $0x8] sm:$0xff] %v1449_v56  ;;  %v1448_v60 = vmul.f32 %v1945_v57, %v1336_v43 }
 0x1f3   : > { %1473 = vst [vmem:[%s2690_s9 + $0x48] sm:$0xff] %v1457_v58  ;;  %v1456_v61 = vmul.f32 %v1947_v59, %v1344_v44 }
 0x1f4   : > { %1464 = vst [vmem:[%s2690_s9] sm:$0xff] %v1448_v60 }
 0x1f5   : > { %1472 = vst [vmem:[%s2690_s9 + $0x40] sm:$0xff] %v1456_v61 }
 0x211   : > { %v1818_v62 = vpop.f32.mrb[2].mxu0 }
 0x212   : > { %v1830_v63 = vpop.f32.mrb[2].mxu1  ;;  %v1316_v0 = vmul.f32 %v1818_v62, %v2672_v32  ;;  %v1237_v2 = vpop.f32.mrb[3].mxu0 }
 0x213   : > { %v1324_v1 = vmul.f32 %v1830_v63, %v2672_v32  ;;  %v1277_v8 = vpop.f32.mrb[3].mxu1  ;;  %v1315_v5 = vmul.f32 %v2672_v32, %v1237_v2 }
 0x214   : > { %v1323_v7 = vmul.f32 %v2672_v32, %v1277_v8  ;;  %v1339_v9 = vadd.f32 %v2677_v33, %v1316_v0 }
 0x215   : > { %v1347_v10 = vadd.f32 %v2677_v33, %v1324_v1  ;;  %v1338_v11 = vadd.f32 %v2677_v33, %v1315_v5 }
 0x216   : > { %v1346_v12 = vadd.f32 %v2677_v33, %v1323_v7  ;;  %v1761_v14 = vmul.f32 -1.442695, %v1339_v9 }
 0x217   : > { %v1769_v13 = vmul.f32 -1.442695, %v1347_v10  ;;  %v1760_v15 = vmul.f32 -1.442695, %v1338_v11 }
 0x218   : > { %v1768_v4 = vmul.f32 -1.442695, %v1346_v12  ;;  %1948 = vpow2.f32 %v1761_v14 }
 0x219   : > { %1950 = vpow2.f32 %v1769_v13 }
 0x21a   : > { %1952 = vpow2.f32 %v1760_v15 }
 0x21b   : > { %1954 = vpow2.f32 %v1768_v4 }
 0x222   : > { %v1949_v16 = vpop.eup %1948 }
 0x223   : > { %v1951_v17 = vpop.eup %1950  ;;  %v1403_v6 = vadd.f32 1.0, %v1949_v16 }
 0x224   : > { %v1953_v18 = vpop.eup %1952  ;;  %v1411_v19 = vadd.f32 1.0, %v1951_v17 }
 0x225   : > { %v1955_v24 = vpop.eup %1954  ;;  %1956 = vrcp.f32 %v1403_v6  ;;  %v1402_v22 = vadd.f32 1.0, %v1953_v18 }
 0x226   : > { %1958 = vrcp.f32 %v1411_v19  ;;  %v1410_v23 = vadd.f32 1.0, %v1955_v24 }
 0x227   : > { %1960 = vrcp.f32 %v1402_v22 }
 0x228   : > { %1962 = vrcp.f32 %v1410_v23 }
 0x22f   : > { %v1957_v26 = vpop.eup %1956 }
 0x230   : > { %v1959_v25 = vpop.eup %1958  ;;  %v1451_v27 = vmul.f32 %v1957_v26, %v1339_v9 }
 0x231   : > { %v1961_v28 = vpop.eup %1960  ;;  %v1459_v29 = vmul.f32 %v1959_v25, %v1347_v10 }
 0x232   : > { %v1963_v31 = vpop.eup %1962  ;;  %1467 = vst [vmem:[%s2690_s9 + $0x18] sm:$0xff] %v1451_v27  ;;  %v1450_v30 = vmul.f32 %v1961_v28, %v1338_v11 }
 0x233   : > { %1475 = vst [vmem:[%s2690_s9 + $0x58] sm:$0xff] %v1459_v29  ;;  %v1458_v34 = vmul.f32 %v1963_v31, %v1346_v12 }
 0x234   : > { %1466 = vst [vmem:[%s2690_s9 + $0x10] sm:$0xff] %v1450_v30 }
 0x235   : > { %1474 = vst [vmem:[%s2690_s9 + $0x50] sm:$0xff] %v1458_v34 }
 0x24d   : > { %v1833_v36 = vpop.f32.mrb[4].mxu1 }
 0x24e   : > { %v1821_v35 = vpop.f32.mrb[4].mxu0  ;;  %v1326_v38 = vmul.f32 %v1833_v36, %v2672_v32  ;;  %v1287_v40 = vpop.f32.mrb[5].mxu1 }
 0x24f   : > { %v1318_v37 = vmul.f32 %v1821_v35, %v2672_v32  ;;  %v1247_v39 = vpop.f32.mrb[5].mxu0  ;;  %v1325_v42 = vmul.f32 %v2672_v32, %v1287_v40 }
 0x250   : > { %v1317_v41 = vmul.f32 %v2672_v32, %v1247_v39  ;;  %v1349_v44 = vadd.f32 %v2677_v33, %v1326_v38 }
 0x251   : > { %v1341_v43 = vadd.f32 %v2677_v33, %v1318_v37  ;;  %v1348_v46 = vadd.f32 %v2677_v33, %v1325_v42 }
 0x252   : > { %v1340_v45 = vadd.f32 %v2677_v33, %v1317_v41  ;;  %v1771_v21 = vmul.f32 -1.442695, %v1349_v44 }
 0x253   : > { %v1763_v47 = vmul.f32 -1.442695, %v1341_v43  ;;  %v1770_v49 = vmul.f32 -1.442695, %v1348_v46 }
 0x254   : > { %v1762_v48 = vmul.f32 -1.442695, %v1340_v45 }
 0x255   : > { %1964 = vpow2.f32 %v1763_v47 }
 0x256   : > { %1966 = vpow2.f32 %v1771_v21 }
 0x257   : > { %1968 = vpow2.f32 %v1762_v48 }
 0x258   : > { %1970 = vpow2.f32 %v1770_v49 }
 0x25f   : > { %v1965_v50 = vpop.eup %1964 }
 0x260   : > { %v1967_v51 = vpop.eup %1966  ;;  %v1405_v52 = vadd.f32 1.0, %v1965_v50 }
 0x261   : > { %v1969_v53 = vpop.eup %1968  ;;  %v1413_v54 = vadd.f32 1.0, %v1967_v51 }
 0x262   : > { %v1971_v55 = vpop.eup %1970  ;;  %1972 = vrcp.f32 %v1405_v52  ;;  %v1404_v3 = vadd.f32 1.0, %v1969_v53 }
 0x263   : > { %1974 = vrcp.f32 %v1413_v54  ;;  %v1412_v20 = vadd.f32 1.0, %v1971_v55 }
 0x264   : > { %1976 = vrcp.f32 %v1404_v3 }
 0x265   : > { %1978 = vrcp.f32 %v1412_v20 }
 0x269   : > { %v1836_v57 = vpop.f32.mrb[6].mxu1 }
 0x26a   : > { %v1824_v56 = vpop.f32.mrb[6].mxu0  ;;  %v1328_v59 = vmul.f32 %v1836_v57, %v2672_v32  ;;  %v1297_v61 = vpop.f32.mrb[7].mxu1 }
 0x26b   : > { %v1320_v58 = vmul.f32 %v1824_v56, %v2672_v32  ;;  %v1257_v60 = vpop.f32.mrb[7].mxu0  ;;  %v1327_v0 = vmul.f32 %v2672_v32, %v1297_v61 }
 0x26c   : > { %v1973_v62 = vpop.eup %1972  ;;  %v1319_v63 = vmul.f32 %v2672_v32, %v1257_v60  ;;  %v1351_v5 = vadd.f32 %v2677_v33, %v1328_v59 }
 0x26d   : > { %v1975_v1 = vpop.eup %1974  ;;  %v1453_v2 = vmul.f32 %v1973_v62, %v1341_v43  ;;  %v1343_v8 = vadd.f32 %v2677_v33, %v1320_v58  ;;  %v1350_v11 = vadd.f32 %v2677_v33, %v1327_v0 }
 0x26e   : > { %v1977_v7 = vpop.eup %1976  ;;  %v1461_v9 = vmul.f32 %v1975_v1, %v1349_v44  ;;  %v1342_v10 = vadd.f32 %v2677_v33, %v1319_v63  ;;  %v1773_v15 = vmul.f32 -1.442695, %v1351_v5 }
 0x26f   : > { %v1979_v12 = vpop.eup %1978  ;;  %1469 = vst [vmem:[%s2690_s9 + $0x28] sm:$0xff] %v1453_v2  ;;  %v1452_v14 = vmul.f32 %v1977_v7, %v1340_v45  ;;  %v1765_v13 = vmul.f32 -1.442695, %v1343_v8  ;;  %v1772_v16 = vmul.f32 -1.442695, %v1350_v11 }
 0x270   : > { %1477 = vst [vmem:[%s2690_s9 + $0x68] sm:$0xff] %v1461_v9  ;;  %v1460_v32 = vmul.f32 %v1979_v12, %v1348_v46  ;;  %v1764_v4 = vmul.f32 -1.442695, %v1342_v10 }
 0x271   : > { %1468 = vst [vmem:[%s2690_s9 + $0x20] sm:$0xff] %v1452_v14  ;;  %1980 = vpow2.f32 %v1765_v13 }
 0x272   : > { %1476 = vst [vmem:[%s2690_s9 + $0x60] sm:$0xff] %v1460_v32  ;;  %1982 = vpow2.f32 %v1773_v15 }
 0x273   : > { %1984 = vpow2.f32 %v1764_v4 }
 0x274   : > { %1986 = vpow2.f32 %v1772_v16 }
 0x27b   : > { %v1981_v17 = vpop.eup %1980 }
 0x27c   : > { %v1983_v6 = vpop.eup %1982  ;;  %v1407_v33 = vadd.f32 1.0, %v1981_v17 }
 0x27d   : > { %v1985_v18 = vpop.eup %1984  ;;  %v1415_v19 = vadd.f32 1.0, %v1983_v6 }
 0x27e   : > { %v1987_v24 = vpop.eup %1986  ;;  %1988 = vrcp.f32 %v1407_v33  ;;  %v1406_v22 = vadd.f32 1.0, %v1985_v18 }
 0x27f   : > { %1990 = vrcp.f32 %v1415_v19  ;;  %v1414_v23 = vadd.f32 1.0, %v1987_v24 }
 0x280   : > { %1992 = vrcp.f32 %v1406_v22 }
 0x281   : > { %1994 = vrcp.f32 %v1414_v23 }
 0x288   : > { %v1989_v26 = vpop.eup %1988 }
 0x289   : > { %v1991_v25 = vpop.eup %1990  ;;  %v1455_v27 = vmul.f32 %v1989_v26, %v1343_v8 }
 0x28a   : > { %v1993_v28 = vpop.eup %1992  ;;  %v1463_v29 = vmul.f32 %v1991_v25, %v1351_v5 }
 0x28b   : > { %v1995_v31 = vpop.eup %1994  ;;  %1471 = vst [vmem:[%s2690_s9 + $0x38] sm:$0xff] %v1455_v27  ;;  %v1454_v30 = vmul.f32 %v1993_v28, %v1342_v10 }
 0x28c   : > { %1479 = vst [vmem:[%s2690_s9 + $0x78] sm:$0xff] %v1463_v29  ;;  %v1462_v34 = vmul.f32 %v1995_v31, %v1350_v11 }
 0x28d   : > { %1470 = vst [vmem:[%s2690_s9 + $0x30] sm:$0xff] %v1454_v30 }
 0x28e   : > { %1478 = vst [vmem:[%s2690_s9 + $0x70] sm:$0xff] %v1462_v34 }
 0x28f   : > { %2009 = shalt.err (!%p2006_p6)
}
 0x290   : > { %s2010_s6 = scalar_lea.hbm %s2735_s18, 2048  ;;  %s2014_s8 = scalar_lea.hbm %s2801_s4, 8192 }
 0x291   : > { %p2011_p7 = scmp.ne.s32.totalorder %s2735_s18, %s2010_s6  ;;  %p2015_p11 = scmp.lt.u32.totalorder %s2735_s18, %s2801_s4 }
 0x292   : > { %p2016_p12 = scmp.lt.u32.totalorder %s2014_s8, %s2010_s6  ;;  %p2018_p0 = scmp.lt.u32.totalorder %s2010_s6, %s2735_s18 }
 0x293   : > { %p2012_p9 = pnand %p2011_p7, %p2178_p3 }
 0x294   : > { %p2017_p13 = por %p2016_p12, %p2015_p11 }
 0x295   : > { %p2013_p10 = pneg %p2012_p9 }
 0x296   : > { %p2019_p1 = por %p2018_p0, %p2017_p13 }
 0x298   : > { %p2020_p2 = pnand %p2019_p1, %p2013_p10 }
 0x29a   : > { %2023 = shalt.err (!%p2020_p2)
}
 0x29b   : > { %s2101_s23 = smov 128  }
 0x29c   : > { %1852 = dma.vmem_to_hbm [thread:$0]  (%p2178_p3), %s2738_s12, 2048, %s2735_s18, %s2744_s19, %s2101_s23, %s2101_s23, %s2093_s24  }
 0x29d PF: > { %p1858_p4 = scmp.ge.s32.totalorder %s2090_s22, 2  ;;  %s1513_s30 = sand.u32 1, %s2062_s15  }
 0x29e   : > { %s1514_s5 = scalar_lea.sflag [#allocation4], %s1513_s30 }
 0x29f   : > { %p1855_p5 = pnand %p1858_p4, %p2187_p8 }
 0x2a1   : > { %2057 = dma.done.wait (!%p1855_p5), %s1514_s5, 2048  }
 0x2a2   : > { %2059 = vsyncadd (!%p1855_p5), %s1514_s5, 4294965248  ;;  %s17_s22 = sadd.s32 1, %s2090_s22   ;;  %s2810_s15 = smov %s2066_s16 }
 0x2a3   : > { %p14_p6 = scmp.ge.s32.totalorder %s17_s22, 6   ;;  %s2811_s16 = smov %s2070_s17 }
 0x2a4   : > { %s2812_s17 = smov %s2196_s7  ;;  %s2813_s18 = smov %s2082_s20 }
 0x2a5   : > { %s2814_s19 = smov %s2086_s21  ;;  %s2815_s20 = smov %s2818_s25 }
 0x2a6   : > { %s2816_s21 = smov %s2822_s26  ;;  %16 = sbr.rel (!%p14_p6) target bundleno = 5 (0x5), region = 87 }
 0x2ad   :  { %1519 = vsyncpa [#allocation4], 1 }
 0x2ae   :  { %1521 = vsyncpa [#allocation4 + $0x1], 1 }

</bundles_post_ra>
